<compile_context>
chip_gen: v6e
topology: v6e:2x2x1
jax: 0.10.0
libtpu: 0.0.40
codegen_flags: <defaults>
</compile_context>

<pallas_src>
import functools

import numpy as np
import jax
import jax.numpy as jnp
from jax.experimental import pallas as pl
from jax.experimental.pallas import tpu as pltpu


def _ls_ce_kernel(x_ref, tgt_ref, o_ref, *, smoothing, inv_num_classes):
    """One (tm, V) tile of logits -> (tm, 1) column of per-sample losses."""
    x = x_ref[...].astype(jnp.float32)                    # (tm, V), cast in VMEM
    tgt = tgt_ref[...]                                    # (tm, 1) int32

    # Small (1, V) class-index iota; broadcasts against (tm, 1) targets.
    col = jax.lax.broadcasted_iota(jnp.int32, (1, x.shape[1]), 1)

    # Numerically-stable log-sum-exp over the class axis.
    m = jnp.max(x, axis=-1, keepdims=True)                # (tm, 1)
    se = jnp.sum(jnp.exp(x - m), axis=-1, keepdims=True)  # (tm, 1)
    lse = m + jnp.log(se)                                 # (tm, 1)

    # x[row, target[row]] via a one-hot masked row sum (targets assumed in [0, V)).
    x_tgt = jnp.sum(jnp.where(col == tgt, x, 0.0), axis=-1, keepdims=True)

    # Sum of logits for the smoothing (mean log-prob) term.
    sum_x = jnp.sum(x, axis=-1, keepdims=True)

    nll = lse - x_tgt                                     # -log p[target]
    smooth = lse - sum_x * inv_num_classes                # -mean_j log p[j]
    o_ref[...] = (1.0 - smoothing) * nll + smoothing * smooth


def label_smoothing_cross_entropy(logits, targets, smoothing=0.1, tm=512):
    """Per-sample label-smoothing CE.  logits: (M, V) float, targets: (M,) int."""
    M, V = logits.shape

    # Row tile: multiple of 8 (sublane), at most ~half the rows so the grid has
    # >= 2 steps (v7x megacore balance) whenever M allows it.
    tm_cap = pl.cdiv(pl.cdiv(M, 2), 8) * 8
    tm = int(max(8, min(tm, tm_cap)))
    grid = pl.cdiv(M, tm)  # ragged last tile handled by Pallas OOB masking

    t = targets.astype(jnp.int32).reshape(M, 1)           # tiny (4*M bytes)

    out = pl.pallas_call(
        functools.partial(
            _ls_ce_kernel,
            smoothing=float(smoothing),
            inv_num_classes=1.0 / float(V),
        ),
        out_shape=jax.ShapeDtypeStruct((M, 1), jnp.float32),
        grid=(grid,),
        in_specs=[
            pl.BlockSpec((tm, V), lambda i: (i, 0)),      # native dtype, no pad/copy
            pl.BlockSpec((tm, 1), lambda i: (i, 0)),
        ],
        out_specs=pl.BlockSpec((tm, 1), lambda i: (i, 0)),
        compiler_params=pltpu.CompilerParams(dimension_semantics=("parallel",)),
    )(logits, t)
    return out[:, 0]


if __name__ == "__main__":
    key = jax.random.PRNGKey(0)
    kx, kt = jax.random.split(key)

    # Shapes consistent with the MAE token-ViT context this loss is used in:
    # (num_tokens, codebook_size=391) logits with integer class targets.
    N, C = 256, 391
    x = 2.0 * jax.random.normal(kx, (N, C), jnp.float32)
    target = jax.random.randint(kt, (N,), 0, C, dtype=jnp.int32)

    loss = label_smoothing_cross_entropy(x, target, smoothing=0.1)
    loss = jax.block_until_ready(loss)

    # Reference (pure JAX) check of the forward semantics.
    logp = jax.nn.log_softmax(x, axis=-1)
    nll = -jnp.take_along_axis(logp, target[:, None], axis=-1)[:, 0]
    ref = 0.9 * nll + 0.1 * (-jnp.mean(logp, axis=-1))

    assert loss.shape == (N,)
    assert np.isfinite(np.asarray(loss)).all()
    assert np.allclose(np.asarray(loss), np.asarray(ref), rtol=1e-5, atol=1e-4)
    print("KERNEL_OK")
</pallas_src>

<mosaic_0001>
module attributes {stable_mosaic.version = 11 : i64} {
  func.func @_ls_ce_kernel(%arg0: i32, %arg1: memref<128x391xf32, #tpu.memory_space<vmem>>, %arg2: memref<128x1xi32, #tpu.memory_space<vmem>>, %arg3: memref<128x1xf32, #tpu.memory_space<vmem>>) attributes {dimension_semantics = [#tpu.dimension_semantics<parallel>], iteration_bounds = array<i64: 2>, scalar_prefetch = 0 : i64, scratch_operands = 0 : i64, tpu.core_type = #tpu.core_type<tc>, window_params = [{transform_indices = @transform_0, window_bounds = array<i64: 128, 391>}, {transform_indices = @transform_1, window_bounds = array<i64: 128, 1>}, {transform_indices = @transform_2, window_bounds = array<i64: 128, 1>}]} {
    %c0 = arith.constant 0 : index
    %c0_0 = arith.constant 0 : index
    %0 = vector.load %arg1[%c0, %c0_0] : memref<128x391xf32, #tpu.memory_space<vmem>>, vector<128x391xf32>
    %c0_1 = arith.constant 0 : index
    %c0_2 = arith.constant 0 : index
    %1 = vector.load %arg2[%c0_1, %c0_2] : memref<128x1xi32, #tpu.memory_space<vmem>>, vector<128x1xi32>
    %2 = tpu.iota {dimensions = array<i32: 1>} : vector<1x391xi32>
    %cst = arith.constant dense<0xFF800000> : vector<128xf32>
    %3 = vector.multi_reduction <maximumf>, %0, %cst [1] : vector<128x391xf32> to vector<128xf32>
    %4 = vector.shape_cast %3 : vector<128xf32> to vector<128x1xf32>
    %5 = vector.broadcast %4 : vector<128x1xf32> to vector<128x391xf32>
    %6 = arith.subf %0, %5 : vector<128x391xf32>
    %7 = math.exp %6 : vector<128x391xf32>
    %cst_3 = arith.constant dense<0.000000e+00> : vector<128xf32>
    %8 = vector.multi_reduction <add>, %7, %cst_3 [1] : vector<128x391xf32> to vector<128xf32>
    %9 = vector.shape_cast %8 : vector<128xf32> to vector<128x1xf32>
    %10 = math.log %9 : vector<128x1xf32>
    %11 = arith.addf %4, %10 : vector<128x1xf32>
    %12 = vector.broadcast %2 : vector<1x391xi32> to vector<128x391xi32>
    %13 = vector.broadcast %1 : vector<128x1xi32> to vector<128x391xi32>
    %14 = arith.cmpi eq, %12, %13 : vector<128x391xi32>
    %cst_4 = arith.constant 0.000000e+00 : f32
    %15 = vector.broadcast %cst_4 : f32 to vector<128x391xf32>
    %16 = arith.select %14, %0, %15 : vector<128x391xi1>, vector<128x391xf32>
    %cst_5 = arith.constant dense<0.000000e+00> : vector<128xf32>
    %17 = vector.multi_reduction <add>, %16, %cst_5 [1] : vector<128x391xf32> to vector<128xf32>
    %18 = vector.shape_cast %17 : vector<128xf32> to vector<128x1xf32>
    %cst_6 = arith.constant dense<0.000000e+00> : vector<128xf32>
    %19 = vector.multi_reduction <add>, %0, %cst_6 [1] : vector<128x391xf32> to vector<128xf32>
    %20 = vector.shape_cast %19 : vector<128xf32> to vector<128x1xf32>
    %21 = arith.subf %11, %18 : vector<128x1xf32>
    %cst_7 = arith.constant 0.00255754474 : f32
    %22 = vector.broadcast %cst_7 : f32 to vector<128x1xf32>
    %23 = arith.mulf %20, %22 : vector<128x1xf32>
    %24 = arith.subf %11, %23 : vector<128x1xf32>
    %cst_8 = arith.constant 0.899999976 : f32
    %25 = vector.broadcast %cst_8 : f32 to vector<128x1xf32>
    %26 = arith.mulf %25, %21 : vector<128x1xf32>
    %cst_9 = arith.constant 1.000000e-01 : f32
    %27 = vector.broadcast %cst_9 : f32 to vector<128x1xf32>
    %28 = arith.mulf %27, %24 : vector<128x1xf32>
    %29 = arith.addf %26, %28 : vector<128x1xf32>
    %c0_10 = arith.constant 0 : index
    %c0_11 = arith.constant 0 : index
    %30 = vector.load %arg3[%c0_10, %c0_11] : memref<128x1xf32, #tpu.memory_space<vmem>>, vector<128x1xf32>
    tpu.vector_store %arg3[%c0_10, %c0_11], %29 {strides = array<i32>} : memref<128x1xf32, #tpu.memory_space<vmem>>, vector<128x1xf32>,
    return
  }
  func.func @transform_0(%arg0: i32) -> (i32, i32) {
    %c0_i32 = arith.constant 0 : i32
    %c0_i32_0 = arith.constant 0 : i32
    return %arg0, %c0_i32 : i32, i32
  }
  func.func @transform_1(%arg0: i32) -> (i32, i32) {
    %c0_i32 = arith.constant 0 : i32
    %c0_i32_0 = arith.constant 0 : i32
    return %arg0, %c0_i32 : i32, i32
  }
  func.func @transform_2(%arg0: i32) -> (i32, i32) {
    %c0_i32 = arith.constant 0 : i32
    %c0_i32_0 = arith.constant 0 : i32
    return %arg0, %c0_i32 : i32, i32
  }
}

</mosaic_0001>

<bundles_post_ra>
// kernel: tpu_custom_call.1
= control target key start
LH: loop header
LB: loop body
LE: loop exit
PB: predicated region body
PF: predicated region fallthrough
CT: control target
= control target key end

     0   :  { %s1513_s9 = smov 0   ;;  %s2698_s0 = inlined_call_operand.vmem [shape: f32[256,391], index: 0, kind: input, shape index: {}]   ;;  %s2699_s1 = inlined_call_operand.vmem [shape: s32[256,1], index: 1, kind: input, shape index: {}]   ;;  %s2700_s2 = inlined_call_operand.vmem [shape: f32[256,1], index: 2, kind: output, shape index: {}]  }
   0x1 LB: > { %s1239_s10 = sadd.s32 4294967295, %s1495_s9   ;;  %p1243_p0 = scmp.ge.s32.totalorder %s1495_s9, 1  ;;  %s1495_s9 = sphi %s1513_s9, %s12_s9  }
   0x2   : > { %p125_p1 = scmp.lt.s32.totalorder %s1495_s9, 3 }
   0x4   : > { %p126_p2 = pnand %p1243_p0, %p125_p1 }
   0x6   : > { %129 = sbr.rel (%p126_p2) target bundleno = 429 (0x1ad), region = 28 }
   0xb   : > { %s1244_s11 = sshll.u32 %s1239_s10, 4  ;;  %v1497_v0 = vmov 0   ;;  %vm259_vm0 = vcmask 56320  }
   0xc   : > { %p154_p3 = scmp.lt.s32.totalorder %s1244_s11, 31  ;;  %1264 = vset.pattern.permute.xlu1 %v1497_v0  ;;  %1263 = vset.pattern.permute.xlu0 %v1497_v0 }
   0xe   : > { %s2833_s11 = smov (!%p154_p3, %s1244_s11), 31 }
   0xf   : > { %s1253_s12 = sshll.u32 %s2833_s11, 5  ;;  %s1248_s16 = sshll.u32 %s2833_s11, 3 }
  0x10   : > { %s1527_s15 = scalar_lea.vmem %s2698_s0, %s1253_s12  ;;  %s1807_s19 = scalar_lea.vmem %s2699_s1, %s1248_s16 }
  0x11   : > { %v1530_v1 = vld [vmem:[%s1527_s15 + $0x40] sm:$0xff]  ;;  %v1533_v2 = vld [vmem:[%s1527_s15 + $0x48] sm:$0xff]  ;;  %v1536_v3 = vld [vmem:[%s1527_s15 + $0x50] sm:$0xff]  ;;  %s2636_s22 = scalar_lea.vmem %s2700_s2, %s1248_s16 }
  0x12   : > { %v1539_v4 = vld [vmem:[%s1527_s15 + $0x58] sm:$0xff]  ;;  %v270_v5 = vmax.f32 %v1530_v1, %v1533_v2  ;;  %v1544_v6 = vld [vmem:[%s1527_s15] sm:$0xff]  ;;  %v1547_v7 = vld [vmem:[%s1527_s15 + $0x8] sm:$0xff] }
  0x13   : > { %v272_v8 = vsel %vm259_vm0, %v1539_v4, -inf  ;;  %v1552_v9 = vld [vmem:[%s1527_s15 + $0x10] sm:$0xff]  ;;  %v1555_v10 = vld [vmem:[%s1527_s15 + $0x18] sm:$0xff]  ;;  %v257_v11 = vmax.f32 %v1544_v6, %v1547_v7  ;;  %v1560_v12 = vld [vmem:[%s1527_s15 + $0x60] sm:$0xff] }
  0x14   : > { %v271_v13 = vmax.f32 %v270_v5, %v1536_v3  ;;  %v260_v14 = vsel %vm259_vm0, %v1555_v10, -inf  ;;  %v1566_v15 = vld [vmem:[%s1527_s15 + $0x68] sm:$0xff]  ;;  %v1569_v16 = vld [vmem:[%s1527_s15 + $0x70] sm:$0xff]  ;;  %v1572_v17 = vld [vmem:[%s1527_s15 + $0x78] sm:$0xff] }
  0x15   : > { %v258_v18 = vmax.f32 %v257_v11, %v1552_v9  ;;  %v276_v19 = vmax.f32 %v1560_v12, %v1566_v15  ;;  %v1578_v20 = vld [vmem:[%s1527_s15 + $0x20] sm:$0xff]  ;;  %v1581_v21 = vld [vmem:[%s1527_s15 + $0x28] sm:$0xff]  ;;  %v1584_v22 = vld [vmem:[%s1527_s15 + $0x30] sm:$0xff]  ;;  %v278_v24 = vsel %vm259_vm0, %v1572_v17, -inf }
  0x16   : > { %v273_v23 = vmax.f32 %v271_v13, %v272_v8  ;;  %v1589_v25 = vld [vmem:[%s1527_s15 + $0x38] sm:$0xff]  ;;  %v264_v26 = vmax.f32 %v1578_v20, %v1581_v21  ;;  %v1594_v27 = vld [vmem:[%s1527_s15 + $0xa0] sm:$0xff]  ;;  %v1597_v28 = vld [vmem:[%s1527_s15 + $0xa8] sm:$0xff] }
  0x17   : > { %v261_v29 = vmax.f32 %v258_v18, %v260_v14  ;;  %v277_v30 = vmax.f32 %v276_v19, %v1569_v16  ;;  %v266_v31 = vsel %vm259_vm0, %v1589_v25, -inf  ;;  %v1603_v32 = vld [vmem:[%s1527_s15 + $0xb0] sm:$0xff]  ;;  %v1606_v33 = vld [vmem:[%s1527_s15 + $0xb8] sm:$0xff]  ;;  %v288_v34 = vmax.f32 %v1594_v27, %v1597_v28  ;;  %v1611_v35 = vld [vmem:[%s1527_s15 + $0x80] sm:$0xff] }
  0x18   : > { %274 = vmax.xlane.f32.xlu1 %v273_v23  ;;  %v265_v36 = vmax.f32 %v264_v26, %v1584_v22  ;;  %v1615_v37 = vld [vmem:[%s1527_s15 + $0x88] sm:$0xff]  ;;  %v1618_v38 = vld [vmem:[%s1527_s15 + $0x90] sm:$0xff]  ;;  %v1621_v39 = vld [vmem:[%s1527_s15 + $0x98] sm:$0xff]  ;;  %v290_v42 = vsel %vm259_vm0, %v1606_v33, -inf }
  0x19   : > { %262 = vmax.xlane.f32.xlu0 %v261_v29  ;;  %v279_v40 = vmax.f32 %v277_v30, %v278_v24  ;;  %v289_v41 = vmax.f32 %v288_v34, %v1603_v32  ;;  %v282_v43 = vmax.f32 %v1611_v35, %v1615_v37  ;;  %v1629_v44 = vld [vmem:[%s1527_s15 + $0xe0] sm:$0xff]  ;;  %v1632_v45 = vld [vmem:[%s1527_s15 + $0xe8] sm:$0xff]  ;;  %v1635_v46 = vld [vmem:[%s1527_s15 + $0xf0] sm:$0xff]  ;;  %v284_v48 = vsel %vm259_vm0, %v1621_v39, -inf }
  0x1a   : > { %2757 = vst [vmem:[#allocation2_spill] sm:$0xff] %v1635_v46  ;;  %v267_v47 = vmax.f32 %v265_v36, %v266_v31  ;;  %v1640_v49 = vld [vmem:[%s1527_s15 + $0xf8] sm:$0xff]  ;;  %v300_v50 = vmax.f32 %v1629_v44, %v1632_v45  ;;  %v1645_v51 = vld [vmem:[%s1527_s15 + $0xc0] sm:$0xff]  ;;  %v1648_v52 = vld [vmem:[%s1527_s15 + $0xc8] sm:$0xff] }
  0x1b   : > { %2758 = vst [vmem:[#allocation3_spill] sm:$0xff] %v1640_v49  ;;  %v283_v53 = vmax.f32 %v282_v43, %v1618_v38  ;;  %v1652_v54 = vld [vmem:[%s1527_s15 + $0xd0] sm:$0xff]  ;;  %v1655_v55 = vld [vmem:[%s1527_s15 + $0xd8] sm:$0xff]  ;;  %v294_v56 = vmax.f32 %v1645_v51, %v1648_v52  ;;  %v1660_v57 = vld [vmem:[%s1527_s15 + $0x120] sm:$0xff]  ;;  %v291_v58 = vmax.f32 %v289_v41, %v290_v42  ;;  %v302_v63 = vsel %vm259_vm0, %v1640_v49, -inf }
  0x1c   : > { %2759 = vst [vmem:[#allocation4_spill] sm:$0xff] %v1660_v57  ;;  %280 = vmax.xlane.f32.xlu1 %v279_v40  ;;  %v301_v59 = vmax.f32 %v300_v50, %v1635_v46  ;;  %v1664_v60 = vld [vmem:[%s1527_s15 + $0x128] sm:$0xff]  ;;  %v1667_v61 = vld [vmem:[%s1527_s15 + $0x130] sm:$0xff]  ;;  %v1673_v5 = vld [vmem:[%s1527_s15 + $0x138] sm:$0xff]  ;;  %v296_v14 = vsel %vm259_vm0, %v1655_v55, -inf }
  0x1d   : > { %2760 = vst [vmem:[#allocation5_spill] sm:$0xff] %v1664_v60  ;;  %2761 = vst [vmem:[#allocation6_spill] sm:$0xff] %v1667_v61  ;;  %268 = vmax.xlane.f32.xlu0 %v267_v47  ;;  %v285_v62 = vmax.f32 %v283_v53, %v284_v48  ;;  %v295_v0 = vmax.f32 %v294_v56, %v1652_v54  ;;  %v312_v8 = vmax.f32 %v1660_v57, %v1664_v60  ;;  %v1678_v11 = vld [vmem:[%s1527_s15 + $0x100] sm:$0xff]  ;;  %v1681_v13 = vld [vmem:[%s1527_s15 + $0x108] sm:$0xff] }
  0x1e   : > { %2762 = vst [vmem:[#allocation7_spill] sm:$0xff] %v1673_v5  ;;  %v1686_v18 = vld [vmem:[%s1527_s15 + $0x110] sm:$0xff]  ;;  %v306_v19 = vmax.f32 %v1678_v11, %v1681_v13  ;;  %v1691_v23 = vld [vmem:[%s1527_s15 + $0x160] sm:$0xff]  ;;  %v1694_v24 = vld [vmem:[%s1527_s15 + $0x168] sm:$0xff]  ;;  %v303_v30 = vmax.f32 %v301_v59, %v302_v63  ;;  %v314_v42 = vsel %vm259_vm0, %v1673_v5, -inf }
  0x1f   : > { %2763 = vst [vmem:[#allocation8_spill] sm:$0xff] %v1691_v23  ;;  %2764 = vst [vmem:[#allocation9_spill] sm:$0xff] %v1694_v24  ;;  %v1697_v26 = vld [vmem:[%s1527_s15 + $0x118] sm:$0xff]  ;;  %v1700_v29 = vld [vmem:[%s1527_s15 + $0x140] sm:$0xff]  ;;  %v313_v31 = vmax.f32 %v312_v8, %v1667_v61  ;;  %v324_v36 = vmax.f32 %v1691_v23, %v1694_v24  ;;  %v297_v41 = vmax.f32 %v295_v0, %v296_v14 }
  0x20   : > { %292 = vmax.xlane.f32.xlu1 %v291_v58  ;;  %v1704_v34 = vld [vmem:[%s1527_s15 + $0x170] sm:$0xff]  ;;  %v1709_v40 = vld [vmem:[%s1527_s15 + $0x148] sm:$0xff]  ;;  %v307_v43 = vmax.f32 %v306_v19, %v1686_v18  ;;  %v1715_v47 = vld [vmem:[%s1527_s15 + $0x178] sm:$0xff]  ;;  %v308_v56 = vsel %vm259_vm0, %v1697_v26, -inf }
  0x21   : > { %2765 = vst [vmem:[#allocation10_spill] sm:$0xff] %v1704_v34  ;;  %286 = vmax.xlane.f32.xlu0 %v285_v62  ;;  %2766 = vst [vmem:[#allocation11_spill] sm:$0xff] %v1715_v47  ;;  %v318_v48 = vmax.f32 %v1700_v29, %v1709_v40  ;;  %v1720_v50 = vld [vmem:[%s1527_s15 + $0x1a0] sm:$0xff]  ;;  %v1723_v53 = vld [vmem:[%s1527_s15 + $0x1a8] sm:$0xff]  ;;  %v315_v0 = vmax.f32 %v313_v31, %v314_v42  ;;  %v325_v8 = vmax.f32 %v324_v36, %v1704_v34 }
  0x22   : > { %2767 = vst [vmem:[#allocation12_spill] sm:$0xff] %v1720_v50  ;;  %2768 = vst [vmem:[#allocation13_spill] sm:$0xff] %v1723_v53  ;;  %v1728_v58 = vld [vmem:[%s1527_s15 + $0x150] sm:$0xff]  ;;  %v1731_v59 = vld [vmem:[%s1527_s15 + $0x180] sm:$0xff]  ;;  %v336_v19 = vmax.f32 %v1720_v50, %v1723_v53  ;;  %v309_v5 = vmax.f32 %v307_v43, %v308_v56  ;;  %v326_v24 = vsel %vm259_vm0, %v1715_v47, -inf }
  0x23   : > { %v1734_v62 = vld [vmem:[%s1527_s15 + $0x188] sm:$0xff]  ;;  %v1737_v63 = vld [vmem:[%s1527_s15 + $0x158] sm:$0xff]  ;;  %v1741_v14 = vld [vmem:[%s1527_s15 + $0x1b0] sm:$0xff]  ;;  %v319_v23 = vmax.f32 %v318_v48, %v1728_v58  ;;  %v327_v53 = vmax.f32 %v325_v8, %v326_v24 }
  0x24   : > { %2769 = vst [vmem:[#allocation14_spill] sm:$0xff] %v1734_v62  ;;  %304 = vmax.xlane.f32.xlu1 %v303_v30  ;;  %2770 = vst [vmem:[#allocation15_spill] sm:$0xff] %v1741_v14  ;;  %v1749_v61 = vld [vmem:[%s1527_s15 + $0x1b8] sm:$0xff]  ;;  %v330_v30 = vmax.f32 %v1731_v59, %v1734_v62  ;;  %v1754_v31 = vld [vmem:[%s1527_s15 + $0x1e0] sm:$0xff]  ;;  %v320_v42 = vsel %vm259_vm0, %v1737_v63, -inf  ;;  %v337_v50 = vmax.f32 %v336_v19, %v1741_v14 }
  0x25   : > { %298 = vmax.xlane.f32.xlu0 %v297_v41  ;;  %2771 = vst [vmem:[#allocation16_spill] sm:$0xff] %v1749_v61  ;;  %2772 = vst [vmem:[#allocation17_spill] sm:$0xff] %v1754_v31  ;;  %v1757_v36 = vld [vmem:[%s1527_s15 + $0x1e8] sm:$0xff]  ;;  %v1762_v41 = vld [vmem:[%s1527_s15 + $0x190] sm:$0xff]  ;;  %v321_v34 = vmax.f32 %v319_v23, %v320_v42  ;;  %v338_v49 = vsel %vm259_vm0, %v1749_v61, -inf }
  0x26   : > { %2773 = vst [vmem:[#allocation18_spill] sm:$0xff] %v1757_v36  ;;  %2774 = vst [vmem:[#allocation19_spill] sm:$0xff] %v1762_v41  ;;  %v1765_v43 = vld [vmem:[%s1527_s15 + $0x1c0] sm:$0xff]  ;;  %v1768_v48 = vld [vmem:[%s1527_s15 + $0x1c8] sm:$0xff]  ;;  %v348_v47 = vmax.f32 %v1754_v31, %v1757_v36  ;;  %v331_v60 = vmax.f32 %v330_v30, %v1762_v41  ;;  %v339_v23 = vmax.f32 %v337_v50, %v338_v49 }
  0x27   : > { %v1771_v56 = vld [vmem:[%s1527_s15 + $0x198] sm:$0xff]  ;;  %v1780_v57 = vld [vmem:[%s1527_s15 + $0x1f0] sm:$0xff]  ;;  %v342_v46 = vmax.f32 %v1765_v43, %v1768_v48 }
  0x28   : > { %2775 = vst [vmem:[#allocation20_spill] sm:$0xff] %v1771_v56  ;;  %316 = vmax.xlane.f32.xlu1 %v315_v0  ;;  %2776 = vst [vmem:[#allocation21_spill] sm:$0xff] %v1780_v57  ;;  %v332_v24 = vsel %vm259_vm0, %v1771_v56, -inf  ;;  %v1787_v0 = vld [vmem:[%s1527_s15 + $0x1f8] sm:$0xff]  ;;  %v1790_v8 = vld [vmem:[%s1527_s15 + $0x1d0] sm:$0xff]  ;;  %v349_v19 = vmax.f32 %v348_v47, %v1780_v57 }
  0x29   : > { %310 = vmax.xlane.f32.xlu0 %v309_v5  ;;  %2777 = vst [vmem:[#allocation22_spill] sm:$0xff] %v1787_v0  ;;  %2778 = vst [vmem:[#allocation23_spill] sm:$0xff] %v1790_v8  ;;  %v1793_v5 = vld [vmem:[%s1527_s15 + $0x1d8] sm:$0xff]  ;;  %v333_v30 = vmax.f32 %v331_v60, %v332_v24  ;;  %v350_v42 = vsel %vm259_vm0, %v1787_v0, -inf  ;;  %v343_v36 = vmax.f32 %v342_v46, %v1790_v8  ;;  %v237_v46 = vld [vmem:[%s1807_s19 + $0x8] sm:$0xff] }
  0x2a   : > { %2779 = vst [vmem:[#allocation24_spill] sm:$0xff] %v1793_v5  ;;  %v344_v31 = vsel %vm259_vm0, %v1793_v5, -inf  ;;  %v351_v61 = vmax.f32 %v349_v19, %v350_v42  ;;  %v238_v49 = vld [vmem:[%s1807_s19 + $0x10] sm:$0xff]  ;;  %v236_v60 = vld [vmem:[%s1807_s19] sm:$0xff]  ;;  %v247_v50 = vld [vmem:[%s1807_s19 + $0x58] sm:$0xff] }
  0x2b   : > { %v345_v14 = vmax.f32 %v343_v36, %v344_v31  ;;  %v240_v47 = vld [vmem:[%s1807_s19 + $0x20] sm:$0xff]  ;;  %v242_v31 = vld [vmem:[%s1807_s19 + $0x30] sm:$0xff]  ;;  %v251_v36 = vld [vmem:[%s1807_s19 + $0x78] sm:$0xff] }
  0x2c   : > { %328 = vmax.xlane.f32.xlu1 %v327_v53  ;;  %v241_v53 = vld [vmem:[%s1807_s19 + $0x28] sm:$0xff]  ;;  %v243_v24 = vld [vmem:[%s1807_s19 + $0x38] sm:$0xff]  ;;  %v246_v19 = vld [vmem:[%s1807_s19 + $0x50] sm:$0xff] }
  0x2d   : > { %322 = vmax.xlane.f32.xlu0 %v321_v34  ;;  %v245_v34 = vld [vmem:[%s1807_s19 + $0x48] sm:$0xff]  ;;  %v250_v42 = vld [vmem:[%s1807_s19 + $0x70] sm:$0xff]  ;;  %v2782_v5 = vld [vmem:[#allocation5_spill] sm:$0xff] }
  0x2e   : > { %v2787_v57 = vld [vmem:[#allocation7_spill] sm:$0xff] }
  0x30   : > { %340 = vmax.xlane.f32.xlu1 %v339_v23  ;;  %v244_v23 = vld [vmem:[%s1807_s19 + $0x40] sm:$0xff] }
  0x31   : > { %334 = vmax.xlane.f32.xlu0 %v333_v30  ;;  %v248_v30 = vld [vmem:[%s1807_s19 + $0x60] sm:$0xff] }
  0x34   : > { %352 = vmax.xlane.f32.xlu1 %v351_v61  ;;  %v239_v61 = vld [vmem:[%s1807_s19 + $0x18] sm:$0xff] }
  0x35   : > { %346 = vmax.xlane.f32.xlu0 %v345_v14  ;;  %v249_v14 = vld [vmem:[%s1807_s19 + $0x68] sm:$0xff] }
  0x45   : > { %694 = vperm.xlu1 %1264, %v237_v46   ;;  %v968_v46 = vadd.f32 %v1581_v21, %v1578_v20 }
  0x49   : > { %697 = vperm.xlu1 %1264, %v238_v49   ;;  %v969_v49 = vadd.f32 %v968_v46, %v1584_v22 }
  0x4b   : > { %691 = vperm.xlu0 %1263, %v236_v60   ;;  %v974_v60 = vadd.f32 %v1533_v2, %v1530_v1 }
  0x4d   : > { %700 = vperm.xlu1 %1264, %v239_v61   ;;  %v970_v61 = vsel %vm259_vm0, %v1589_v25, 0.0 }
  0x4f   : > { %718 = vperm.xlu0 %1263, %v245_v34   ;;  %v971_v34 = vadd.f32 %v970_v61, %v969_v49  ;;  %v1012_v61 = vsel %vm259_vm0, %v1697_v26, 0.0 }
  0x51   : > { %703 = vperm.xlu1 %1264, %v240_v47   ;;  %v975_v47 = vadd.f32 %v974_v60, %v1536_v3  ;;  %v1022_v60 = vadd.f32 %v1709_v40, %v1700_v29 }
  0x53   : > { %724 = vperm.xlu0 %1263, %v247_v50   ;;  %v986_v50 = vadd.f32 %v1615_v37, %v1611_v35 }
  0x55   : > { %706 = vperm.xlu1 %1264, %v241_v53   ;;  %v976_v53 = vsel %vm259_vm0, %v1539_v4, 0.0 }
  0x57   : > { %730 = vperm.xlu0 %1263, %v249_v14   ;;  %v977_v14 = vadd.f32 %v976_v53, %v975_v47  ;;  %v1034_v53 = vadd.f32 %v1734_v62, %v1731_v59 }
  0x59   : > { %709 = vperm.xlu1 %1264, %v242_v31   ;;  %v987_v31 = vadd.f32 %v986_v50, %v1618_v38  ;;  %v1023_v50 = vadd.f32 %v1022_v60, %v1728_v58  ;;  %v982_v60 = vsel %vm259_vm0, %v1572_v17, 0.0 }
  0x5b   : > { %736 = vperm.xlu0 %1263, %v251_v36   ;;  %v998_v36 = vadd.f32 %v1648_v52, %v1645_v51 }
  0x5d   : > { %712 = vperm.xlu1 %1264, %v243_v24   ;;  %v988_v24 = vsel %vm259_vm0, %v1621_v39, 0.0 }
  0x61   : > { %715 = vperm.xlu1 %1264, %v244_v23   ;;  %v989_v23 = vadd.f32 %v988_v24, %v987_v31  ;;  %v964_v24 = vsel %vm259_vm0, %v1555_v10, 0.0 }
  0x65   : > { %721 = vperm.xlu1 %1264, %v246_v19   ;;  %v999_v19 = vadd.f32 %v998_v36, %v1652_v54  ;;  %v980_v36 = vadd.f32 %v1566_v15, %v1560_v12 }
  0x69   : > { %727 = vperm.xlu1 %1264, %v248_v30   ;;  %v1010_v30 = vadd.f32 %v1681_v13, %v1678_v11 }
  0x6b   : > { %v1011_v49 = vadd.f32 %v1010_v30, %v1686_v18  ;;  %v1036_v30 = vsel %vm259_vm0, %v1771_v56, 0.0 }
  0x6d   : > { %733 = vperm.xlu1 %1264, %v250_v42   ;;  %v1000_v42 = vsel %vm259_vm0, %v1655_v55, 0.0  ;;  %v1013_v47 = vadd.f32 %v1012_v61, %v1011_v49  ;;  %v992_v49 = vadd.f32 %v1597_v28, %v1594_v27 }
  0x6e   : > { %v1001_v46 = vadd.f32 %v1000_v42, %v999_v19  ;;  %v1035_v19 = vadd.f32 %v1034_v53, %v1762_v41  ;;  %v994_v53 = vsel %vm259_vm0, %v1606_v33, 0.0 }
  0x70   : > { %v1037_v61 = vadd.f32 %v1036_v30, %v1035_v19 }
  0x7a   : > { %972 = vadd.xlane.f32.xlu0 %v971_v34  ;;  %v962_v34 = vadd.f32 %v1547_v7, %v1544_v6 }
  0x7c   : > { %v963_v31 = vadd.f32 %v962_v34, %v1552_v9 }
  0x7e   : > { %978 = vadd.xlane.f32.xlu0 %v977_v14  ;;  %v1024_v14 = vsel %vm259_vm0, %v1737_v63, 0.0  ;;  %v965_v42 = vadd.f32 %v964_v24, %v963_v31  ;;  %v2780_v31 = vld [vmem:[#allocation2_spill] sm:$0xff]  ;;  %v2781_v24 = vld [vmem:[#allocation4_spill] sm:$0xff] }
  0x7f   : > { %v1016_v8 = vadd.f32 %v2782_v5, %v2781_v24 }
  0x82   : > { %990 = vadd.xlane.f32.xlu0 %v989_v23  ;;  %v1025_v23 = vadd.f32 %v1024_v14, %v1023_v50  ;;  %v1004_v50 = vadd.f32 %v1632_v45, %v1629_v44 }
  0x86   : > { %1002 = vadd.xlane.f32.xlu0 %v1001_v46  ;;  %v981_v46 = vadd.f32 %v980_v36, %v1569_v16  ;;  %v1005_v36 = vadd.f32 %v1004_v50, %v2780_v31 }
  0x88   : > { %v983_v34 = vadd.f32 %v982_v60, %v981_v46  ;;  %v2786_v60 = vld [vmem:[#allocation9_spill] sm:$0xff] }
  0x8a   : > { %1014 = vadd.xlane.f32.xlu0 %v1013_v47  ;;  %v993_v47 = vadd.f32 %v992_v49, %v1603_v32  ;;  %v2785_v49 = vld [vmem:[#allocation8_spill] sm:$0xff] }
  0x8b   : > { %v1028_v0 = vadd.f32 %v2786_v60, %v2785_v49 }
  0x8c   : > { %v995_v14 = vadd.f32 %v994_v53, %v993_v47  ;;  %v2788_v47 = vld [vmem:[#allocation10_spill] sm:$0xff]  ;;  %v2789_v53 = vld [vmem:[#allocation11_spill] sm:$0xff] }
  0x8d   : > { %v1029_v50 = vadd.f32 %v1028_v0, %v2788_v47  ;;  %v1030_v56 = vsel %vm259_vm0, %v2789_v53, 0.0 }
  0x8e   : > { %1026 = vadd.xlane.f32.xlu0 %v1025_v23  ;;  %v2783_v23 = vld [vmem:[#allocation3_spill] sm:$0xff] }
  0x8f   : > { %v1006_v19 = vsel %vm259_vm0, %v2783_v23, 0.0 }
  0x90   : > { %v1007_v30 = vadd.f32 %v1006_v19, %v1005_v36 }
  0x91   : > { %966 = vadd.xlane.f32.xlu1 %v965_v42  ;;  %v2784_v42 = vld [vmem:[#allocation6_spill] sm:$0xff] }
  0x92   : > { %1038 = vadd.xlane.f32.xlu0 %v1037_v61  ;;  %v1017_v46 = vadd.f32 %v1016_v8, %v2784_v42  ;;  %v1018_v61 = vsel %vm259_vm0, %v2787_v57, 0.0 }
  0x95   : > { %984 = vadd.xlane.f32.xlu1 %v983_v34  ;;  %v1019_v34 = vadd.f32 %v1018_v61, %v1017_v46 }
  0x99   : > { %996 = vadd.xlane.f32.xlu1 %v995_v14  ;;  %v1031_v14 = vadd.f32 %v1030_v56, %v1029_v50 }
  0x9d   : > { %1008 = vadd.xlane.f32.xlu1 %v1007_v30 }
  0xa1   : > { %v1890_v41 = vpop.xlane.xlu1 %274  ;;  %1020 = vadd.xlane.f32.xlu1 %v1019_v34 }
  0xa2   : > { %2790 = vst [vmem:[#allocation2_spill] sm:$0xff] %v1890_v41  ;;  %v362_v8 = vsub.f32 %v1530_v1, %v1890_v41  ;;  %v363_v36 = vsub.f32 %v1533_v2, %v1890_v41  ;;  %v364_v19 = vsub.f32 %v1536_v3, %v1890_v41  ;;  %v365_v30 = vsub.f32 %v1539_v4, %v1890_v41  ;;  %v1900_v0 = vpop.xlane.xlu0 %262 }
  0xa3   : > { %2791 = vst [vmem:[#allocation4_spill] sm:$0xff] %v1900_v0  ;;  %v354_v46 = vsub.f32 %v1544_v6, %v1900_v0  ;;  %v355_v56 = vsub.f32 %v1547_v7, %v1900_v0  ;;  %v356_v2 = vsub.f32 %v1552_v9, %v1900_v0  ;;  %v357_v3 = vsub.f32 %v1555_v10, %v1900_v0 }
  0xa4   : > { %v434_v61 = vmul.f32 1.442695, %v362_v8  ;;  %v436_v34 = vmul.f32 1.442695, %v363_v36  ;;  %v438_v1 = vmul.f32 1.442695, %v364_v19 }
  0xa5   : > { %v440_v50 = vmul.f32 1.442695, %v365_v30  ;;  %v1910_v62 = vpop.xlane.xlu1 %280  ;;  %1032 = vadd.xlane.f32.xlu1 %v1031_v14  ;;  %v418_v4 = vmul.f32 1.442695, %v354_v46  ;;  %v420_v7 = vmul.f32 1.442695, %v355_v56 }
  0xa6   : > { %2792 = vst [vmem:[#allocation5_spill] sm:$0xff] %v1910_v62  ;;  %1265 = vpow2.f32 %v434_v61  ;;  %v366_v6 = vsub.f32 %v1560_v12, %v1910_v62  ;;  %v367_v8 = vsub.f32 %v1566_v15, %v1910_v62  ;;  %v1916_v36 = vpop.xlane.xlu0 %268  ;;  %v422_v9 = vmul.f32 1.442695, %v356_v2 }
  0xa7   : > { %1267 = vpow2.f32 %v436_v34  ;;  %2793 = vst [vmem:[#allocation3_spill] sm:$0xff] %v1916_v36  ;;  %v368_v10 = vsub.f32 %v1569_v16, %v1910_v62  ;;  %v424_v19 = vmul.f32 1.442695, %v357_v3  ;;  %v369_v14 = vsub.f32 %v1572_v17, %v1910_v62 }
  0xa8   : > { %1269 = vpow2.f32 %v438_v1  ;;  %v442_v12 = vmul.f32 1.442695, %v366_v6  ;;  %v358_v46 = vsub.f32 %v1578_v20, %v1916_v36  ;;  %v444_v15 = vmul.f32 1.442695, %v367_v8 }
  0xa9   : > { %1271 = vpow2.f32 %v440_v50  ;;  %v1922_v30 = vpop.xlane.xlu1 %292  ;;  %v359_v56 = vsub.f32 %v1581_v21, %v1916_v36  ;;  %v446_v61 = vmul.f32 1.442695, %v368_v10  ;;  %v360_v16 = vsub.f32 %v1584_v22, %v1916_v36 }
  0xaa   : > { %2794 = vst [vmem:[#allocation6_spill] sm:$0xff] %v1922_v30  ;;  %1273 = vpow2.f32 %v418_v4  ;;  %v448_v34 = vmul.f32 1.442695, %v369_v14  ;;  %v361_v17 = vsub.f32 %v1589_v25, %v1916_v36  ;;  %v252_v2 = vlaneseq  ;;  %v1936_v3 = vpop.xlane.xlu0 %286 }
  0xab   : > { %1275 = vpow2.f32 %v420_v7  ;;  %v426_v20 = vmul.f32 1.442695, %v358_v46  ;;  %v374_v50 = vsub.f32 %v1594_v27, %v1922_v30  ;;  %2796 = vst [vmem:[#allocation9_spill] sm:$0xff] %v1936_v3  ;;  %v428_v21 = vmul.f32 1.442695, %v359_v56 }
  0xac   : > { %1277 = vpow2.f32 %v422_v9  ;;  %v375_v22 = vsub.f32 %v1597_v28, %v1922_v30  ;;  %v430_v4 = vmul.f32 1.442695, %v360_v16  ;;  %v376_v25 = vsub.f32 %v1603_v32, %v1922_v30 }
  0xad   : > { %1279 = vpow2.f32 %v424_v19  ;;  %v1932_v1 = vpop.xlane.xlu1 %304  ;;  %v432_v6 = vmul.f32 1.442695, %v361_v17  ;;  %v377_v7 = vsub.f32 %v1606_v33, %v1922_v30  ;;  %v1946_v27 = vand.u32 127, %v252_v2 }
  0xae   : > { %2795 = vst [vmem:[#allocation8_spill] sm:$0xff] %v1932_v1  ;;  %1281 = vpow2.f32 %v442_v12  ;;  %v458_v9 = vmul.f32 1.442695, %v374_v50  ;;  %v370_v10 = vsub.f32 %v1611_v35, %v1936_v3  ;;  %v460_v19 = vmul.f32 1.442695, %v375_v22 }
  0xaf   : > { %1283 = vpow2.f32 %v444_v15  ;;  %v371_v32 = vsub.f32 %v1615_v37, %v1936_v3  ;;  %v372_v14 = vsub.f32 %v1618_v38, %v1936_v3  ;;  %v462_v12 = vmul.f32 1.442695, %v376_v25  ;;  %v1960_v15 = vpop.xlane.xlu0 %298 }
  0xb0   : > { %1285 = vpow2.f32 %v446_v61  ;;  %v373_v46 = vsub.f32 %v1621_v39, %v1936_v3  ;;  %2798 = vst [vmem:[#allocation10_spill] sm:$0xff] %v1960_v15  ;;  %v464_v56 = vmul.f32 1.442695, %v377_v7  ;;  %v1967_v37 = vadd.s32 128, %v1946_v27 }
  0xb1   : > { %1287 = vpow2.f32 %v448_v34  ;;  %v1944_v8 = vpop.xlane.xlu1 %316  ;;  %v450_v38 = vmul.f32 1.442695, %v370_v10  ;;  %v382_v34 = vsub.f32 %v1629_v44, %v1932_v1  ;;  %v1974_v39 = vadd.s32 384, %v1946_v27 }
  0xb2   : > { %2797 = vst [vmem:[#allocation7_spill] sm:$0xff] %v1944_v8  ;;  %1289 = vpow2.f32 %v426_v20  ;;  %v452_v2 = vmul.f32 1.442695, %v371_v32  ;;  %v454_v20 = vmul.f32 1.442695, %v372_v14  ;;  %v383_v50 = vsub.f32 %v1632_v45, %v1932_v1  ;;  %v2802_v32 = vld [vmem:[#allocation12_spill] sm:$0xff] }
  0xb3   : > { %v1950_v28 = vpop.eup %1265  ;;  %1291 = vpow2.f32 %v428_v21  ;;  %v456_v22 = vmul.f32 1.442695, %v373_v46  ;;  %v385_v44 = vsub.f32 %v2783_v23, %v1932_v1  ;;  %v379_v7 = vsub.f32 %v1648_v52, %v1960_v15 }
  0xb4   : > { %v1956_v33 = vpop.eup %1267  ;;  %1293 = vpow2.f32 %v430_v4  ;;  %v384_v4 = vsub.f32 %v2780_v31, %v1932_v1  ;;  %v380_v45 = vsub.f32 %v1652_v54, %v1960_v15  ;;  %v474_v31 = vmul.f32 1.442695, %v382_v34 }
  0xb5   : > { %v1962_v35 = vpop.eup %1269  ;;  %1295 = vpow2.f32 %v432_v6  ;;  %v1964_v61 = vpop.xlane.xlu1 %328  ;;  %v378_v6 = vsub.f32 %v1645_v51, %v1960_v15  ;;  %v2002_v23 = vadd.f32 %v1768_v48, %v1765_v43  ;;  %v2803_v51 = vld [vmem:[#allocation13_spill] sm:$0xff]  ;;  %v476_v54 = vmul.f32 1.442695, %v383_v50 }
  0xb6   : > { %2799 = vst [vmem:[#allocation11_spill] sm:$0xff] %v1964_v61  ;;  %v1969_v16 = vpop.eup %1271  ;;  %1297 = vpow2.f32 %v458_v9  ;;  %v2006_v14 = vadd.f32 %v2803_v51, %v2802_v32  ;;  %v390_v46 = vsub.f32 %v2781_v24, %v1944_v8  ;;  %v480_v34 = vmul.f32 1.442695, %v385_v44 }
  0xb7   : > { %v1976_v17 = vpop.eup %1273  ;;  %1299 = vpow2.f32 %v460_v19  ;;  %v1998_v19 = vpop.xlane.xlu0 %310  ;;  %v391_v1 = vsub.f32 %v2782_v5, %v1944_v8  ;;  %v466_v3 = vmul.f32 1.442695, %v378_v6  ;;  %v470_v50 = vmul.f32 1.442695, %v380_v45 }
  0xb8   : > { %v1980_v21 = vpop.eup %1275  ;;  %1301 = vpow2.f32 %v462_v12  ;;  %2801 = vst [vmem:[#allocation26_spill] sm:$0xff] %v1998_v19  ;;  %v381_v12 = vsub.f32 %v1655_v55, %v1960_v15  ;;  %v392_v24 = vsub.f32 %v2784_v42, %v1944_v8  ;;  %v386_v5 = vsub.f32 %v1678_v11, %v1998_v19 }
  0xb9   : > { %v1986_v25 = vpop.eup %1277  ;;  %1303 = vpow2.f32 %v464_v56  ;;  %v1994_v9 = vpop.xlane.xlu1 %340  ;;  %v490_v44 = vmul.f32 1.442695, %v390_v46  ;;  %v387_v6 = vsub.f32 %v1681_v13, %v1998_v19  ;;  %v492_v45 = vmul.f32 1.442695, %v391_v1 }
  0xba   : > { %2800 = vst [vmem:[#allocation25_spill] sm:$0xff] %v1994_v9  ;;  %v1996_v10 = vpop.eup %1279  ;;  %1305 = vpow2.f32 %v450_v38  ;;  %v478_v38 = vmul.f32 1.442695, %v384_v4  ;;  %v388_v42 = vsub.f32 %v1686_v18, %v1998_v19  ;;  %v399_v13 = vsub.f32 %v2786_v60, %v1964_v61 }
  0xbb   : > { %v2008_v52 = vpop.eup %1281  ;;  %1307 = vpow2.f32 %v452_v2  ;;  %v468_v2 = vmul.f32 1.442695, %v379_v7  ;;  %v400_v1 = vsub.f32 %v2788_v47, %v1964_v61 }
  0xbc   : > { %v2014_v56 = vpop.eup %1283  ;;  %1309 = vpow2.f32 %v454_v20  ;;  %v393_v20 = vsub.f32 %v2787_v57, %v1944_v8  ;;  %v389_v57 = vsub.f32 %v1697_v26, %v1998_v19  ;;  %v494_v26 = vmul.f32 1.442695, %v392_v24 }
  0xbd   : > { %v2018_v30 = vpop.eup %1285  ;;  %1311 = vpow2.f32 %v456_v22  ;;  %v2020_v62 = vpop.xlane.xlu1 %352  ;;  %v472_v22 = vmul.f32 1.442695, %v381_v12  ;;  %v486_v47 = vmul.f32 1.442695, %v388_v42 }
  0xbe   : > { %v2022_v55 = vpop.eup %1287  ;;  %1313 = vpow2.f32 %v474_v31  ;;  %v2040_v31 = vpop.xlane.xlu0 %322  ;;  %v496_v46 = vmul.f32 1.442695, %v393_v20  ;;  %v488_v15 = vmul.f32 1.442695, %v389_v57 }
  0xbf   : > { %v2030_v4 = vpop.eup %1289  ;;  %1315 = vpow2.f32 %v476_v54  ;;  %2804 = vst [vmem:[#allocation12_spill] sm:$0xff] %v2040_v31  ;;  %v398_v54 = vsub.f32 %v2785_v49, %v1964_v61  ;;  %v401_v49 = vsub.f32 %v2789_v53, %v1964_v61  ;;  %v394_v60 = vsub.f32 %v1700_v29, %v2040_v31 }
  0xc0   : > { %v2034_v7 = vpop.eup %1291  ;;  %1317 = vpow2.f32 %v478_v38  ;;  %v482_v38 = vmul.f32 1.442695, %v386_v5  ;;  %v510_v5 = vmul.f32 1.442695, %v400_v1  ;;  %v396_v29 = vsub.f32 %v1728_v58, %v2040_v31 }
  0xc1   : > { %v2042_v11 = vpop.eup %1293  ;;  %1319 = vpow2.f32 %v480_v34  ;;  %v2050_v12 = vpop.permute.xlu1 %694  ;;  %v484_v34 = vmul.f32 1.442695, %v387_v6  ;;  %v506_v20 = vmul.f32 1.442695, %v398_v54  ;;  %v397_v53 = vsub.f32 %v1737_v63, %v2040_v31 }
  0xc2   : > { %v2052_v18 = vpop.eup %1295  ;;  %1321 = vpow2.f32 %v466_v3  ;;  %v395_v3 = vsub.f32 %v1709_v40, %v2040_v31  ;;  %v512_v40 = vmul.f32 1.442695, %v401_v49  ;;  %v498_v57 = vmul.f32 1.442695, %v394_v60  ;;  %v2080_v1 = vpop.xlane.xlu0 %334  ;;  %v2806_v49 = vld [vmem:[#allocation16_spill] sm:$0xff] }
  0xc3   : > { %v2054_v8 = vpop.eup %1297  ;;  %1323 = vpow2.f32 %v468_v2  ;;  %v508_v2 = vmul.f32 1.442695, %v399_v13  ;;  %v407_v58 = vsub.f32 %v2803_v51, %v1994_v9  ;;  %v548_v60 = vsel %vm259_vm0, %v1996_v10, 0.0  ;;  %v2808_v10 = vld [vmem:[#allocation19_spill] sm:$0xff] }
  0xc4   : > { %v2060_v19 = vpop.eup %1299  ;;  %1325 = vpow2.f32 %v470_v50  ;;  %v546_v50 = vadd.f32 %v1980_v21, %v1976_v17  ;;  %v2805_v21 = vld [vmem:[#allocation15_spill] sm:$0xff]  ;;  %v504_v61 = vmul.f32 1.442695, %v397_v53  ;;  %v404_v0 = vsub.f32 %v2808_v10, %v2080_v1 }
  0xc5   : > { %v2064_v24 = vpop.eup %1301  ;;  %1327 = vpow2.f32 %v472_v22  ;;  %v406_v22 = vsub.f32 %v2802_v32, %v1994_v9  ;;  %v2076_v54 = vpop.permute.xlu1 %697  ;;  %v409_v32 = vsub.f32 %v2806_v49, %v1994_v9  ;;  %vm742_vm4 = vcmp.eq.s32.totalorder %v1946_v27, %v2050_v12 }
  0xc6   : > { %v2066_v6 = vpop.eup %1303  ;;  %1329 = vpow2.f32 %v490_v44  ;;  %v500_v44 = vmul.f32 1.442695, %v395_v3  ;;  %v547_v63 = vadd.f32 %v1986_v25, %v546_v50  ;;  %v502_v3 = vmul.f32 1.442695, %v396_v29  ;;  %v2807_v50 = vld [vmem:[#allocation14_spill] sm:$0xff] }
  0xc7   : > { %v1306_v42 = vpop.eup %1305  ;;  %1331 = vpow2.f32 %v492_v45  ;;  %v408_v45 = vsub.f32 %v2805_v21, %v1994_v9  ;;  %v522_v25 = vmul.f32 1.442695, %v406_v22  ;;  %v403_v41 = vsub.f32 %v2807_v50, %v2080_v1 }
  0xc8   : > { %v1308_v13 = vpop.eup %1307  ;;  %1333 = vpow2.f32 %v494_v26  ;;  %v549_v51 = vadd.f32 %v548_v60, %v547_v63  ;;  %v524_v9 = vmul.f32 1.442695, %v407_v58  ;;  %v2101_v53 = vmul.f32 1.442695, %v409_v32  ;;  %v2809_v58 = vld [vmem:[#allocation20_spill] sm:$0xff] }
  0xc9   : > { %v1310_v17 = vpop.eup %1309  ;;  %1335 = vpow2.f32 %v496_v46  ;;  %v402_v46 = vsub.f32 %v1731_v59, %v2080_v1  ;;  %v560_v59 = vsel %vm259_vm0, %v1969_v16, 0.0  ;;  %v2105_v22 = vpop.permute.xlu1 %700  ;;  %v405_v63 = vsub.f32 %v2809_v58, %v2080_v1 }
  0xca   : > { %v1312_v26 = vpop.eup %1311  ;;  %1337 = vpow2.f32 %v482_v38  ;;  %550 = vadd.xlane.f32.xlu0 %v549_v51  ;;  %v558_v38 = vadd.f32 %v1956_v33, %v1950_v28  ;;  %v552_v28 = vadd.f32 %v2034_v7, %v2030_v4  ;;  %v564_v16 = vadd.f32 %v2014_v56, %v2008_v52 }
  0xcb   : > { %v2089_v31 = vpop.eup %1313  ;;  %1339 = vpow2.f32 %v484_v34  ;;  %v526_v34 = vmul.f32 1.442695, %v408_v45  ;;  %v2114_v45 = vmul.f32 1.442695, %v403_v41  ;;  %v2118_v51 = vmul.f32 1.442695, %v404_v0 }
  0xcc   : > { %v1316_v36 = vpop.eup %1315  ;;  %1341 = vpow2.f32 %v486_v47  ;;  %v559_v60 = vadd.f32 %v1962_v35, %v558_v38  ;;  %v553_v50 = vadd.f32 %v2042_v11, %v552_v28  ;;  %v554_v35 = vsel %vm259_vm0, %v2052_v18, 0.0 }
  0xcd   : > { %v2099_v29 = vpop.eup %1317  ;;  %1343 = vpow2.f32 %v488_v15  ;;  %v514_v15 = vmul.f32 1.442695, %v402_v46  ;;  %v565_v4 = vadd.f32 %v2018_v30, %v564_v16  ;;  %v570_v7 = vadd.f32 %v1308_v13, %v1306_v42  ;;  %v2129_v18 = vpop.permute.xlu1 %703  ;;  %v2810_v42 = vld [vmem:[#allocation17_spill] sm:$0xff]  ;;  %v2811_v13 = vld [vmem:[#allocation18_spill] sm:$0xff] }
  0xce   : > { %v2107_v47 = vpop.eup %1319  ;;  %1345 = vpow2.f32 %v506_v20  ;;  %v561_v20 = vadd.f32 %v560_v59, %v559_v60  ;;  %v566_v52 = vsel %vm259_vm0, %v2022_v55, 0.0  ;;  %v572_v0 = vsel %vm259_vm0, %v1312_v26, 0.0  ;;  %v2812_v60 = vld [vmem:[#allocation21_spill] sm:$0xff] }
  0xcf   : > { %v1322_v33 = vpop.eup %1321  ;;  %1347 = vpow2.f32 %v508_v2  ;;  %v555_v2 = vadd.f32 %v554_v35, %v553_v50  ;;  %v520_v11 = vmul.f32 1.442695, %v405_v63  ;;  %v415_v46 = vsub.f32 %v2811_v13, %v2020_v62 }
  0xd0   : > { %v1324_v32 = vpop.eup %1323  ;;  %1349 = vpow2.f32 %v510_v5  ;;  %562 = vadd.xlane.f32.xlu0 %v561_v20  ;;  %v571_v5 = vadd.f32 %v1310_v17, %v570_v7  ;;  %v588_v58 = vadd.f32 %v1316_v36, %v2089_v31  ;;  %v416_v28 = vsub.f32 %v2812_v60, %v2020_v62 }
  0xd1   : > { %v1326_v10 = vpop.eup %1325  ;;  %1351 = vpow2.f32 %v512_v40  ;;  %v576_v40 = vadd.f32 %v2060_v19, %v2054_v8  ;;  %556 = vadd.xlane.f32.xlu1 %v555_v2  ;;  %v582_v55 = vadd.f32 %v1324_v32, %v1322_v33  ;;  %v2136_v8 = vpop.xlane.xlu0 %346  ;;  %v578_v16 = vsel %vm259_vm0, %v2066_v6, 0.0 }
  0xd2   : > { %v1328_v41 = vpop.eup %1327  ;;  %1353 = vpow2.f32 %v498_v57  ;;  %v414_v57 = vsub.f32 %v2810_v42, %v2020_v62  ;;  %v573_v38 = vadd.f32 %v572_v0, %v571_v5  ;;  %v540_v20 = vmul.f32 1.442695, %v415_v46 }
  0xd3   : > { %v1330_v56 = vpop.eup %1329  ;;  %1355 = vpow2.f32 %v500_v44  ;;  %v567_v44 = vadd.f32 %v566_v52, %v565_v4  ;;  %v584_v17 = vsel %vm259_vm0, %v1328_v41, 0.0  ;;  %v577_v19 = vadd.f32 %v2064_v24, %v576_v40 }
  0xd4   : > { %v1332_v30 = vpop.eup %1331  ;;  %1357 = vpow2.f32 %v502_v3  ;;  %v583_v3 = vadd.f32 %v1326_v10, %v582_v55  ;;  %574 = vadd.xlane.f32.xlu0 %v573_v38  ;;  %v538_v32 = vmul.f32 1.442695, %v414_v57  ;;  %v410_v36 = vsub.f32 %v1765_v43, %v2136_v8  ;;  %v2151_v10 = vpop.permute.xlu1 %706 }
  0xd5   : > { %v1334_v26 = vpop.eup %1333  ;;  %1359 = vpow2.f32 %v504_v61  ;;  %v2813_v61 = vld [vmem:[#allocation22_spill] sm:$0xff]  ;;  %568 = vadd.xlane.f32.xlu1 %v567_v44  ;;  %v579_v6 = vadd.f32 %v578_v16, %v577_v19  ;;  %v600_v4 = vadd.f32 %v1332_v30, %v1330_v56  ;;  %v542_v2 = vmul.f32 1.442695, %v416_v28 }
  0xd6   : > { %v1336_v59 = vpop.eup %1335  ;;  %1361 = vpow2.f32 %v522_v25  ;;  %v417_v33 = vsub.f32 %v2813_v61, %v2020_v62  ;;  %v585_v24 = vadd.f32 %v584_v17, %v583_v3  ;;  %v530_v5 = vmul.f32 1.442695, %v410_v36 }
  0xd7   : > { %v1338_v63 = vpop.eup %1337  ;;  %1363 = vpow2.f32 %v524_v9  ;;  %v411_v9 = vsub.f32 %v1768_v48, %v2136_v8  ;;  %v601_v57 = vadd.f32 %v1334_v26, %v600_v4  ;;  %v602_v44 = vsel %vm259_vm0, %v1336_v59, 0.0 }
  0xd8   : > { %v1340_v25 = vpop.eup %1339  ;;  %1365 = vpow2.f32 %v526_v34  ;;  %v589_v34 = vadd.f32 %v2099_v29, %v588_v58  ;;  %586 = vadd.xlane.f32.xlu0 %v585_v24  ;;  %v544_v52 = vmul.f32 1.442695, %v417_v33  ;;  %v2164_v38 = vpop.permute.xlu1 %709  ;;  %v1052_v26 = vadd.f32 %v2811_v13, %v2810_v42 }
  0xd9   : > { %v1342_v50 = vpop.eup %1341  ;;  %1367 = vpow2.f32 %v2101_v53  ;;  %v594_v31 = vadd.f32 %v1340_v25, %v1338_v63  ;;  %v590_v53 = vsel %vm259_vm0, %v2107_v47, 0.0  ;;  %580 = vadd.xlane.f32.xlu1 %v579_v6  ;;  %v1041_v59 = vadd.f32 %v2006_v14, %v2805_v21 }
  0xda   : > { %v1344_v35 = vpop.eup %1343  ;;  %1369 = vpow2.f32 %v514_v15  ;;  %v2814_v15 = vld [vmem:[#allocation23_spill] sm:$0xff]  ;;  %v591_v30 = vadd.f32 %v590_v53, %v589_v34  ;;  %v1042_v25 = vsel %vm259_vm0, %v2806_v49, 0.0  ;;  %v1053_v14 = vadd.f32 %v1052_v26, %v2812_v60 }
  0xdb   : > { %v1346_v7 = vpop.eup %1345  ;;  %1371 = vpow2.f32 %v2114_v45  ;;  %v595_v43 = vadd.f32 %v1342_v50, %v594_v31  ;;  %v596_v41 = vsel %vm259_vm0, %v1344_v35, 0.0  ;;  %v412_v0 = vsub.f32 %v2814_v15, %v2136_v8  ;;  %v2815_v45 = vld [vmem:[#allocation24_spill] sm:$0xff] }
  0xdc   : > { %v1348_v48 = vpop.eup %1347  ;;  %1373 = vpow2.f32 %v2118_v51  ;;  %v413_v56 = vsub.f32 %v2815_v45, %v2136_v8  ;;  %v532_v51 = vmul.f32 1.442695, %v411_v9  ;;  %v1048_v3 = vsel %vm259_vm0, %v2815_v45, 0.0  ;;  %v2181_v9 = vpop.permute.xlu1 %712 }
  0xdd   : > { %v1350_v29 = vpop.eup %1349  ;;  %1375 = vpow2.f32 %v520_v11  ;;  %v597_v40 = vadd.f32 %v596_v41, %v595_v43  ;;  %v612_v46 = vadd.f32 %v1348_v48, %v1346_v7  ;;  %v1047_v11 = vadd.f32 %v2002_v23, %v2814_v15  ;;  %592 = vadd.xlane.f32.xlu1 %v591_v30  ;;  %v1425_v43 = vld [vmem:[%s1527_s15] sm:$0xff]  ;;  %v1426_v48 = vld [vmem:[%s1527_s15 + $0x8] sm:$0xff] }
  0xde   : > { %v1352_v47 = vpop.eup %1351  ;;  %1377 = vpow2.f32 %v538_v32  ;;  %v534_v19 = vmul.f32 1.442695, %v412_v0  ;;  %v536_v63 = vmul.f32 1.442695, %v413_v56  ;;  %v603_v23 = vadd.f32 %v602_v44, %v601_v57 }
  0xdf   : > { %v1354_v55 = vpop.eup %1353  ;;  %1379 = vpow2.f32 %v540_v20  ;;  %598 = vadd.xlane.f32.xlu0 %v597_v40  ;;  %v613_v16 = vadd.f32 %v1350_v29, %v612_v46  ;;  %v692_v20 = vpop.permute.xlu0 %691  ;;  %v614_v13 = vsel %vm259_vm0, %v1352_v47, 0.0  ;;  %v1054_v31 = vsel %vm259_vm0, %v2813_v61, 0.0 }
  0xe0   : > { %v1356_v17 = vpop.eup %1355  ;;  %1381 = vpow2.f32 %v542_v2  ;;  %vm738_vm1 = vcmp.eq.s32.totalorder %v1946_v27, %v692_v20  ;;  %vm739_vm2 = vcmp.eq.s32.totalorder %v1967_v37, %v692_v20  ;;  %v2185_v34 = vadd.f32 %v1048_v3, %v1047_v11 }
  0xe1   : > { %v1358_v58 = vpop.eup %1357  ;;  %1383 = vpow2.f32 %v544_v52  ;;  %v606_v28 = vadd.f32 %v1356_v17, %v1354_v55  ;;  %604 = vadd.xlane.f32.xlu1 %v603_v23  ;;  %v615_v6 = vadd.f32 %v614_v13, %v613_v16  ;;  %v2188_v4 = vadd.s32 256, %v1946_v27  ;;  %v2219_v55 = vpop.permute.xlu1 %715  ;;  %v1432_v13 = vld [vmem:[%s1527_s15 + $0x28] sm:$0xff] }
  0xe2   : > { %v1360_v33 = vpop.eup %1359  ;;  %1385 = vpow2.f32 %v530_v5  ;;  %vm741_vm3 = vcmp.eq.s32.totalorder %v1974_v39, %v692_v20  ;;  %v802_v41 = vsel %vm738_vm1, %v1425_v43, 0.0  ;;  %v803_v61 = vsel %vm739_vm2, %v1426_v48, 0.0  ;;  %v1427_v5 = vld [vmem:[%s1527_s15 + $0x18] sm:$0xff]  ;;  %v1435_v43 = vld [vmem:[%s1527_s15 + $0x50] sm:$0xff] }
  0xe3   : > { %v1362_v32 = vpop.eup %1361  ;;  %1387 = vpow2.f32 %v532_v51  ;;  %v607_v24 = vadd.f32 %v1358_v58, %v606_v28  ;;  %v608_v42 = vsel %vm259_vm0, %v1360_v33, 0.0  ;;  %v2200_v52 = vadd.f32 %v1042_v25, %v1041_v59  ;;  %v1428_v51 = vld [vmem:[%s1527_s15 + $0x10] sm:$0xff]  ;;  %v1429_v28 = vld [vmem:[%s1527_s15 + $0x40] sm:$0xff]  ;;  %v1430_v33 = vld [vmem:[%s1527_s15 + $0x48] sm:$0xff]  ;;  %v2251_v25 = vpop.permute.xlu0 %718 }
  0xe4   : > { %v1364_v50 = vpop.eup %1363  ;;  %1389 = vpow2.f32 %v534_v19  ;;  %vm740_vm5 = vcmp.eq.s32.totalorder %v2188_v4, %v692_v20  ;;  %v2203_v15 = vadd.f32 %v1054_v31, %v1053_v14  ;;  %vm743_vm6 = vcmp.eq.s32.totalorder %v1967_v37, %v2050_v12  ;;  %v1436_v48 = vld [vmem:[%s1527_s15 + $0x58] sm:$0xff] }
  0xe5   : > { %v1366_v21 = vpop.eup %1365  ;;  %1391 = vpow2.f32 %v536_v63  ;;  %v609_v49 = vadd.f32 %v608_v42, %v607_v24  ;;  %v624_v36 = vadd.f32 %v1364_v50, %v1362_v32  ;;  %616 = vadd.xlane.f32.xlu1 %v615_v6  ;;  %vm746_vm7 = vcmp.eq.s32.totalorder %v1946_v27, %v2076_v54  ;;  %v1431_v24 = vld [vmem:[%s1527_s15 + $0x20] sm:$0xff] }
  0xe6   : > { %v1368_v35 = vpop.eup %1367  ;;  %vm747_vm8 = vcmp.eq.s32.totalorder %v1967_v37, %v2076_v54  ;;  %vm750_vm9 = vcmp.eq.s32.totalorder %v1946_v27, %v2105_v22  ;;  %v805_v40 = vsel %vm741_vm3, %v1427_v5, 0.0  ;;  %v866_v47 = vadd.f32 %v803_v61, %v802_v41 }
  0xe7   : > { %v1370_v60 = vpop.eup %1369  ;;  %610 = vadd.xlane.f32.xlu0 %v609_v49  ;;  %v625_v7 = vadd.f32 %v1366_v21, %v624_v36  ;;  %v626_v53 = vsel %vm259_vm0, %v1368_v35, 0.0  ;;  %vm751_vm10 = vcmp.eq.s32.totalorder %v1967_v37, %v2105_v22  ;;  %v804_v44 = vsel %vm740_vm5, %v1428_v51, 0.0  ;;  %v1433_v21 = vld [vmem:[%s1527_s15 + $0x80] sm:$0xff]  ;;  %v1434_v36 = vld [vmem:[%s1527_s15 + $0x88] sm:$0xff] }
  0xe8   : > { %v1372_v2 = vpop.eup %1371  ;;  %vm754_vm11 = vcmp.eq.s32.totalorder %v1946_v27, %v2129_v18  ;;  %vm755_vm12 = vcmp.eq.s32.totalorder %v1967_v37, %v2129_v18  ;;  %vm762_vm13 = vcmp.eq.s32.totalorder %v1946_v27, %v2164_v38  ;;  %vm763_vm14 = vcmp.eq.s32.totalorder %v1967_v37, %v2164_v38 }
  0xe9   : > { %v1374_v0 = vpop.eup %1373  ;;  %v618_v29 = vadd.f32 %v1372_v2, %v1370_v60  ;;  %v627_v56 = vadd.f32 %v626_v53, %v625_v7  ;;  %v2233_v26 = vsel %vm259_vm0, %v805_v40, 0.0  ;;  %vm748_vm15 = vcmp.eq.s32.totalorder %v2188_v4, %v2076_v54  ;;  %v2278_v7 = vpop.permute.xlu1 %721  ;;  %v1438_v40 = vld [vmem:[%s1527_s15 + $0x38] sm:$0xff] }
  0xea   : > { %v1376_v45 = vpop.eup %1375  ;;  %vm758_vm1 = vcmp.eq.s32.totalorder %v1946_v27, %v2151_v10  ;;  %vm759_vm2 = vcmp.eq.s32.totalorder %v1967_v37, %v2151_v10  ;;  %v867_v63 = vadd.f32 %v866_v47, %v804_v44  ;;  %vm749_vm3 = vcmp.eq.s32.totalorder %v1974_v39, %v2076_v54  ;;  %v2315_v44 = vpop.permute.xlu0 %724 }
  0xeb   : > { %v1378_v30 = vpop.eup %1377  ;;  %v619_v57 = vadd.f32 %v1374_v0, %v618_v29  ;;  %v620_v46 = vsel %vm259_vm0, %v1376_v45, 0.0  ;;  %628 = vadd.xlane.f32.xlu1 %v627_v56  ;;  %v810_v59 = vsel %vm746_vm7, %v1429_v28, 0.0  ;;  %v811_v23 = vsel %vm747_vm8, %v1430_v33, 0.0  ;;  %v1437_v56 = vld [vmem:[%s1527_s15 + $0x30] sm:$0xff] }
  0xec   : > { %v1380_v11 = vpop.eup %1379  ;;  %v806_v42 = vsel %vm742_vm4, %v1431_v24, 0.0  ;;  %v807_v50 = vsel %vm743_vm6, %v1432_v13, 0.0  ;;  %vm744_vm5 = vcmp.eq.s32.totalorder %v2188_v4, %v2050_v12  ;;  %vm745_vm7 = vcmp.eq.s32.totalorder %v1974_v39, %v2050_v12  ;;  %v1441_v12 = vld [vmem:[%s1527_s15 + $0x60] sm:$0xff]  ;;  %v1445_v24 = vld [vmem:[%s1527_s15 + $0x70] sm:$0xff]  ;;  %v1446_v13 = vld [vmem:[%s1527_s15 + $0x78] sm:$0xff] }
  0xed   : > { %v1382_v17 = vpop.eup %1381  ;;  %v621_v19 = vadd.f32 %v620_v46, %v619_v57  ;;  %v636_v3 = vadd.f32 %v1380_v11, %v1378_v30  ;;  %v818_v49 = vsel %vm754_vm11, %v1433_v21, 0.0  ;;  %v819_v31 = vsel %vm755_vm12, %v1434_v36, 0.0  ;;  %v1439_v30 = vld [vmem:[%s1527_s15 + $0x90] sm:$0xff]  ;;  %v1440_v46 = vld [vmem:[%s1527_s15 + $0x98] sm:$0xff]  ;;  %v2336_v33 = vpop.permute.xlu1 %727 }
  0xee   : > { %v1384_v58 = vpop.eup %1383  ;;  %vm770_vm4 = vcmp.eq.s32.totalorder %v1946_v27, %v2219_v55  ;;  %vm756_vm8 = vcmp.eq.s32.totalorder %v2188_v4, %v2129_v18  ;;  %vm757_vm11 = vcmp.eq.s32.totalorder %v1974_v39, %v2129_v18  ;;  %v812_v41 = vsel %vm748_vm15, %v1435_v43, 0.0 }
  0xef   : > { %v1386_v16 = vpop.eup %1385  ;;  %622 = vadd.xlane.f32.xlu0 %v621_v19  ;;  %v637_v32 = vadd.f32 %v1382_v17, %v636_v3  ;;  %v638_v20 = vsel %vm259_vm0, %v1384_v58, 0.0  ;;  %v813_v61 = vsel %vm749_vm3, %v1436_v48, 0.0  ;;  %v878_v2 = vadd.f32 %v811_v23, %v810_v59  ;;  %v1442_v19 = vld [vmem:[%s1527_s15 + $0x68] sm:$0xff]  ;;  %v1443_v23 = vld [vmem:[%s1527_s15 + $0xc0] sm:$0xff] }
  0xf0   : > { %v1388_v14 = vpop.eup %1387  ;;  %v872_v0 = vadd.f32 %v807_v50, %v806_v42  ;;  %vm766_vm12 = vcmp.eq.s32.totalorder %v1946_v27, %v2181_v9  ;;  %vm767_vm6 = vcmp.eq.s32.totalorder %v1967_v37, %v2181_v9  ;;  %v808_v54 = vsel %vm744_vm5, %v1437_v56, 0.0  ;;  %v1452_v56 = vld [vmem:[%s1527_s15 + $0xd8] sm:$0xff] }
  0xf1   : > { %v1390_v35 = vpop.eup %1389  ;;  %v630_v6 = vadd.f32 %v1388_v14, %v1386_v16  ;;  %v639_v60 = vadd.f32 %v638_v20, %v637_v32  ;;  %v890_v5 = vadd.f32 %v819_v31, %v818_v49  ;;  %v809_v47 = vsel %vm745_vm7, %v1438_v40, 0.0  ;;  %v1444_v32 = vld [vmem:[%s1527_s15 + $0xc8] sm:$0xff]  ;;  %v1447_v49 = vld [vmem:[%s1527_s15 + $0xa0] sm:$0xff]  ;;  %v1453_v40 = vld [vmem:[%s1527_s15 + $0xb0] sm:$0xff] }
  0xf2   : > { %v1392_v53 = vpop.eup %1391  ;;  %v820_v57 = vsel %vm756_vm8, %v1439_v30, 0.0  ;;  %v821_v51 = vsel %vm757_vm11, %v1440_v46, 0.0  ;;  %vm752_vm15 = vcmp.eq.s32.totalorder %v2188_v4, %v2105_v22  ;;  %vm753_vm3 = vcmp.eq.s32.totalorder %v1974_v39, %v2105_v22  ;;  %v1448_v31 = vld [vmem:[%s1527_s15 + $0xa8] sm:$0xff]  ;;  %v1454_v30 = vld [vmem:[%s1527_s15 + $0xb8] sm:$0xff] }
  0xf3   : > { %v631_v29 = vadd.f32 %v1390_v35, %v630_v6  ;;  %v632_v45 = vsel %vm259_vm0, %v1392_v53, 0.0  ;;  %640 = vadd.xlane.f32.xlu1 %v639_v60  ;;  %v814_v17 = vsel %vm750_vm9, %v1441_v12, 0.0  ;;  %v815_v18 = vsel %vm751_vm10, %v1442_v19, 0.0  ;;  %v2376_v60 = vpop.permute.xlu0 %730  ;;  %v1457_v19 = vld [vmem:[%s1527_s15 + $0x118] sm:$0xff] }
  0xf4   : > { %v2328_v3 = vadd.f32 %v2233_v26, %v867_v63  ;;  %v879_v58 = vadd.f32 %v878_v2, %v812_v41  ;;  %v880_v28 = vsel %vm259_vm0, %v813_v61, 0.0  ;;  %v873_v59 = vadd.f32 %v872_v0, %v808_v54  ;;  %v1449_v61 = vld [vmem:[%s1527_s15 + $0xd0] sm:$0xff]  ;;  %v1451_v0 = vld [vmem:[%s1527_s15 + $0x108] sm:$0xff] }
  0xf5   : > { %v633_v11 = vadd.f32 %v632_v45, %v631_v29  ;;  %vm778_vm9 = vcmp.eq.s32.totalorder %v1946_v27, %v2278_v7  ;;  %vm779_vm5 = vcmp.eq.s32.totalorder %v1967_v37, %v2278_v7  ;;  %v874_v26 = vsel %vm259_vm0, %v809_v47, 0.0  ;;  %v2401_v45 = vpop.permute.xlu1 %733 }
  0xf6   : > { %v891_v63 = vadd.f32 %v890_v5, %v820_v57  ;;  %v826_v16 = vsel %vm762_vm13, %v1443_v23, 0.0  ;;  %v892_v20 = vsel %vm259_vm0, %v821_v51, 0.0  ;;  %v816_v42 = vsel %vm752_vm15, %v1445_v24, 0.0  ;;  %v1456_v51 = vld [vmem:[%s1527_s15 + $0xe8] sm:$0xff] }
  0xf7   : > { %634 = vadd.xlane.f32.xlu0 %v633_v11  ;;  %1044 = vadd.xlane.f32.xlu1 %v2200_v52  ;;  %v827_v52 = vsel %vm763_vm14, %v1444_v32, 0.0  ;;  %v817_v50 = vsel %vm753_vm3, %v1446_v13, 0.0  ;;  %v884_v14 = vadd.f32 %v815_v18, %v814_v17  ;;  %vm764_vm10 = vcmp.eq.s32.totalorder %v2188_v4, %v2164_v38  ;;  %v1461_v24 = vld [vmem:[%s1527_s15 + $0x148] sm:$0xff] }
  0xf8   : > { %v902_v21 = vadd.f32 %v827_v52, %v826_v16  ;;  %v822_v36 = vsel %vm758_vm1, %v1447_v49, 0.0  ;;  %v823_v35 = vsel %vm759_vm2, %v1448_v31, 0.0  ;;  %vm774_vm13 = vcmp.eq.s32.totalorder %v1946_v27, %v2251_v25  ;;  %v1459_v16 = vld [vmem:[%s1527_s15 + $0x110] sm:$0xff]  ;;  %v1460_v52 = vld [vmem:[%s1527_s15 + $0x140] sm:$0xff]  ;;  %v1463_v31 = vld [vmem:[%s1527_s15 + $0x158] sm:$0xff] }
  0xf9   : > { %v2368_v22 = vadd.f32 %v880_v28, %v879_v58  ;;  %v875_v6 = vadd.f32 %v874_v26, %v873_v59  ;;  %vm765_vm14 = vcmp.eq.s32.totalorder %v1974_v39, %v2164_v38  ;;  %vm760_vm1 = vcmp.eq.s32.totalorder %v2188_v4, %v2151_v10  ;;  %v1455_v38 = vld [vmem:[%s1527_s15 + $0xe0] sm:$0xff]  ;;  %v2442_v58 = vpop.permute.xlu0 %736  ;;  %v1458_v26 = vld [vmem:[%s1527_s15 + $0xf8] sm:$0xff] }
  0xfa   : > { %vm775_vm7 = vcmp.eq.s32.totalorder %v1967_v37, %v2251_v25  ;;  %v2380_v53 = vadd.f32 %v892_v20, %v891_v63  ;;  %v886_v43 = vsel %vm259_vm0, %v817_v50, 0.0  ;;  %vm761_vm2 = vcmp.eq.s32.totalorder %v1974_v39, %v2151_v10 }
  0xfb   : > { %1050 = vadd.xlane.f32.xlu0 %v2185_v34  ;;  %1056 = vadd.xlane.f32.xlu1 %v2203_v15  ;;  %v896_v41 = vadd.f32 %v823_v35, %v822_v36  ;;  %v885_v48 = vadd.f32 %v884_v14, %v816_v42  ;;  %v828_v2 = vsel %vm764_vm10, %v1449_v61, 0.0  ;;  %v1450_v34 = vld [vmem:[%s1527_s15 + $0x100] sm:$0xff]  ;;  %vm2816_vm8 = vcmp.eq.s32.totalorder %v1967_v37, %v2219_v55  ;;  %v1462_v14 = vld [vmem:[%s1527_s15 + $0xf0] sm:$0xff] }
  0xfc   : > { %v834_v15 = vsel %vm770_vm4, %v1450_v34, 0.0  ;;  %v835_v29 = vsel %vm2816_vm8, %v1451_v0, 0.0  ;;  %vm786_vm11 = vcmp.eq.s32.totalorder %v1946_v27, %v2336_v33  ;;  %vm787_vm15 = vcmp.eq.s32.totalorder %v1967_v37, %v2336_v33  ;;  %v1467_v34 = vld [vmem:[%s1527_s15 + $0x150] sm:$0xff]  ;;  %v1468_v0 = vld [vmem:[%s1527_s15 + $0x138] sm:$0xff] }
  0xfd   : > { %v829_v54 = vsel %vm765_vm14, %v1452_v56, 0.0  ;;  %v903_v5 = vadd.f32 %v902_v21, %v828_v2  ;;  %v824_v47 = vsel %vm760_vm1, %v1453_v40, 0.0  ;;  %vm773_vm4 = vcmp.eq.s32.totalorder %v1974_v39, %v2219_v55  ;;  %v1470_v40 = vld [vmem:[%s1527_s15 + $0x188] sm:$0xff] }
  0xfe   : > { %v825_v57 = vsel %vm761_vm2, %v1454_v30, 0.0  ;;  %vm769_vm3 = vcmp.eq.s32.totalorder %v1974_v39, %v2181_v9  ;;  %v830_v46 = vsel %vm766_vm12, %v1455_v38, 0.0  ;;  %v831_v11 = vsel %vm767_vm6, %v1456_v51, 0.0  ;;  %v1471_v30 = vld [vmem:[%s1527_s15 + $0x190] sm:$0xff]  ;;  %v1472_v38 = vld [vmem:[%s1527_s15 + $0x198] sm:$0xff] }
  0xff   : > { %vm782_vm10 = vcmp.eq.s32.totalorder %v1946_v27, %v2315_v44  ;;  %870 = vadd.xlane.f32.xlu0 %v2328_v3  ;;  %876 = vadd.xlane.f32.xlu1 %v875_v6  ;;  %v897_v10 = vadd.f32 %v896_v41, %v824_v47  ;;  %vm772_vm14 = vcmp.eq.s32.totalorder %v2188_v4, %v2219_v55  ;;  %v837_v18 = vsel %vm773_vm4, %v1457_v19, 0.0 }
 0x100   : > { %v914_v12 = vadd.f32 %v835_v29, %v834_v15  ;;  %vm794_vm1 = vcmp.eq.s32.totalorder %v1946_v27, %v2401_v45  ;;  %v887_v17 = vadd.f32 %v886_v43, %v885_v48  ;;  %vm768_vm6 = vcmp.eq.s32.totalorder %v2188_v4, %v2181_v9  ;;  %v1465_v43 = vld [vmem:[%s1527_s15 + $0x128] sm:$0xff]  ;;  %v1466_v48 = vld [vmem:[%s1527_s15 + $0x130] sm:$0xff] }
 0x101   : > { %v908_v3 = vadd.f32 %v831_v11, %v830_v46  ;;  %v904_v28 = vsel %vm259_vm0, %v829_v54, 0.0  ;;  %v898_v59 = vsel %vm259_vm0, %v825_v57, 0.0  ;;  %v833_v63 = vsel %vm769_vm3, %v1458_v26, 0.0  ;;  %v1477_v26 = vld [vmem:[%s1527_s15 + $0x178] sm:$0xff] }
 0x102   : > { %vm781_vm2 = vcmp.eq.s32.totalorder %v1974_v39, %v2278_v7  ;;  %vm790_vm8 = vcmp.eq.s32.totalorder %v1946_v27, %v2376_v60  ;;  %vm791_vm4 = vcmp.eq.s32.totalorder %v1967_v37, %v2376_v60  ;;  %vm795_vm12 = vcmp.eq.s32.totalorder %v1967_v37, %v2401_v45 }
 0x103   : > { %v905_v23 = vadd.f32 %v904_v28, %v903_v5  ;;  %v836_v32 = vsel %vm772_vm14, %v1459_v16, 0.0  ;;  %v842_v20 = vsel %vm778_vm9, %v1460_v52, 0.0  ;;  %v843_v42 = vsel %vm779_vm5, %v1461_v24, 0.0  ;;  %882 = vadd.xlane.f32.xlu0 %v2368_v22  ;;  %888 = vadd.xlane.f32.xlu1 %v887_v17  ;;  %v1464_v22 = vld [vmem:[%s1527_s15 + $0x120] sm:$0xff]  ;;  %v1476_v28 = vld [vmem:[%s1527_s15 + $0x170] sm:$0xff]  ;;  %v1480_v24 = vld [vmem:[%s1527_s15 + $0x1a8] sm:$0xff] }
 0x104   : > { %v899_v13 = vadd.f32 %v898_v59, %v897_v10  ;;  %v915_v50 = vadd.f32 %v914_v12, %v836_v32  ;;  %v916_v55 = vsel %vm259_vm0, %v837_v18, 0.0  ;;  %v832_v21 = vsel %vm768_vm6, %v1462_v14, 0.0  ;;  %v1469_v5 = vld [vmem:[%s1527_s15 + $0x180] sm:$0xff]  ;;  %v1475_v18 = vld [vmem:[%s1527_s15 + $0x168] sm:$0xff] }
 0x105   : > { %vm798_vm9 = vcmp.eq.s32.totalorder %v1946_v27, %v2442_v58  ;;  %v909_v49 = vadd.f32 %v908_v3, %v832_v21  ;;  %v910_v36 = vsel %vm259_vm0, %v833_v63, 0.0  ;;  %vm780_vm5 = vcmp.eq.s32.totalorder %v2188_v4, %v2278_v7  ;;  %v1473_v10 = vld [vmem:[%s1527_s15 + $0x160] sm:$0xff]  ;;  %v1478_v32 = vld [vmem:[%s1527_s15 + $0x1c8] sm:$0xff] }
 0x106   : > { %v845_v35 = vsel %vm781_vm2, %v1463_v31, 0.0  ;;  %v926_v9 = vadd.f32 %v843_v42, %v842_v20  ;;  %vm776_vm14 = vcmp.eq.s32.totalorder %v2188_v4, %v2251_v25  ;;  %vm777_vm6 = vcmp.eq.s32.totalorder %v1974_v39, %v2251_v25  ;;  %v1474_v17 = vld [vmem:[%s1527_s15 + $0x1c0] sm:$0xff] }
 0x107   : > { %v838_v6 = vsel %vm774_vm13, %v1464_v22, 0.0  ;;  %vm788_vm2 = vcmp.eq.s32.totalorder %v2188_v4, %v2336_v33  ;;  %vm789_vm3 = vcmp.eq.s32.totalorder %v1974_v39, %v2336_v33  ;;  %v839_v41 = vsel %vm775_vm7, %v1465_v43, 0.0  ;;  %894 = vadd.xlane.f32.xlu0 %v2380_v53  ;;  %900 = vadd.xlane.f32.xlu1 %v899_v13  ;;  %v1479_v52 = vld [vmem:[%s1527_s15 + $0x1a0] sm:$0xff] }
 0x108   : > { %v840_v61 = vsel %vm776_vm14, %v1466_v48, 0.0  ;;  %v917_v2 = vadd.f32 %v916_v55, %v915_v50  ;;  %v844_v15 = vsel %vm780_vm5, %v1467_v34, 0.0  ;;  %v841_v29 = vsel %vm777_vm6, %v1468_v0, 0.0  ;;  %v1481_v55 = vld [vmem:[%s1527_s15 + $0x1b0] sm:$0xff]  ;;  %v1486_v0 = vld [vmem:[%s1527_s15 + $0x1f8] sm:$0xff] }
 0x109   : > { %v920_v56 = vadd.f32 %v839_v41, %v838_v6  ;;  %v911_v25 = vadd.f32 %v910_v36, %v909_v49  ;;  %v928_v54 = vsel %vm259_vm0, %v845_v35, 0.0  ;;  %v850_v53 = vsel %vm786_vm11, %v1469_v5, 0.0  ;;  %v1482_v36 = vld [vmem:[%s1527_s15 + $0x1b8] sm:$0xff]  ;;  %v1483_v35 = vld [vmem:[%s1527_s15 + $0x1e0] sm:$0xff]  ;;  %v1484_v6 = vld [vmem:[%s1527_s15 + $0x1e8] sm:$0xff] }
 0x10a   : > { %v851_v47 = vsel %vm787_vm15, %v1470_v40, 0.0  ;;  %v927_v7 = vadd.f32 %v926_v9, %v844_v15  ;;  %v852_v57 = vsel %vm788_vm2, %v1471_v30, 0.0  ;;  %v853_v46 = vsel %vm789_vm3, %v1472_v38, 0.0 }
 0x10b   : > { %v921_v51 = vadd.f32 %v920_v56, %v840_v61  ;;  %v922_v11 = vsel %vm259_vm0, %v841_v29, 0.0  ;;  %vm784_vm13 = vcmp.eq.s32.totalorder %v2188_v4, %v2315_v44  ;;  %vm785_vm7 = vcmp.eq.s32.totalorder %v1974_v39, %v2315_v44  ;;  %906 = vadd.xlane.f32.xlu0 %v905_v23  ;;  %912 = vadd.xlane.f32.xlu1 %v911_v25  ;;  %v1487_v29 = vld [vmem:[%s1527_s15 + $0x1d0] sm:$0xff]  ;;  %v1488_v25 = vld [vmem:[%s1527_s15 + $0x1d8] sm:$0xff] }
 0x10c   : > { %v846_v12 = vsel %vm782_vm10, %v1473_v10, 0.0  ;;  %v938_v33 = vadd.f32 %v851_v47, %v850_v53  ;;  %v858_v19 = vsel %vm794_vm1, %v1474_v17, 0.0  ;;  %vm2817_vm11 = vcmp.eq.s32.totalorder %v1967_v37, %v2315_v44 }
 0x10d   : > { %v847_v3 = vsel %vm2817_vm11, %v1475_v18, 0.0  ;;  %v848_v59 = vsel %vm784_vm13, %v1476_v28, 0.0  ;;  %v849_v63 = vsel %vm785_vm7, %v1477_v26, 0.0  ;;  %vm792_vm15 = vcmp.eq.s32.totalorder %v2188_v4, %v2376_v60 }
 0x10e   : > { %v932_v23 = vadd.f32 %v847_v3, %v846_v12  ;;  %vm793_vm10 = vcmp.eq.s32.totalorder %v1974_v39, %v2376_v60  ;;  %v923_v16 = vadd.f32 %v922_v11, %v921_v51  ;;  %v859_v44 = vsel %vm795_vm12, %v1478_v32, 0.0 }
 0x10f   : > { %v854_v20 = vsel %vm790_vm8, %v1479_v52, 0.0  ;;  %v855_v42 = vsel %vm791_vm4, %v1480_v24, 0.0  ;;  %v934_v50 = vsel %vm259_vm0, %v849_v63, 0.0  ;;  %v856_v14 = vsel %vm792_vm15, %v1481_v55, 0.0  ;;  %918 = vadd.xlane.f32.xlu0 %v917_v2  ;;  %v1485_v2 = vld [vmem:[%s1527_s15 + $0x1f0] sm:$0xff] }
 0x110   : > { %v933_v13 = vadd.f32 %v932_v23, %v848_v59  ;;  %v944_v21 = vadd.f32 %v855_v42, %v854_v20  ;;  %v929_v49 = vadd.f32 %v928_v54, %v927_v7  ;;  %924 = vadd.xlane.f32.xlu1 %v923_v16  ;;  %v857_v31 = vsel %vm793_vm10, %v1482_v36, 0.0 }
 0x111   : > { %vm800_vm12 = vcmp.eq.s32.totalorder %v2188_v4, %v2442_v58  ;;  %v862_v9 = vsel %vm798_vm9, %v1483_v35, 0.0  ;;  %v939_v22 = vadd.f32 %v938_v33, %v852_v57  ;;  %vm796_vm1 = vcmp.eq.s32.totalorder %v2188_v4, %v2401_v45  ;;  %v973_v57 = vpop.xlane.xlu0 %972 }
 0x112   : > { %vm801_vm8 = vcmp.eq.s32.totalorder %v1974_v39, %v2442_v58  ;;  %vm2818_vm4 = vcmp.eq.s32.totalorder %v1967_v37, %v2442_v58  ;;  %v950_v43 = vadd.f32 %v859_v44, %v858_v19  ;;  %v935_v41 = vadd.f32 %v934_v50, %v933_v13 }
 0x113   : > { %v863_v60 = vsel %vm2818_vm4, %v1484_v6, 0.0  ;;  %v945_v48 = vadd.f32 %v944_v21, %v856_v14  ;;  %vm797_vm9 = vcmp.eq.s32.totalorder %v1974_v39, %v2401_v45  ;;  %v946_v61 = vsel %vm259_vm0, %v857_v31, 0.0  ;;  %930 = vadd.xlane.f32.xlu0 %v929_v49 }
 0x114   : > { %v956_v27 = vadd.f32 %v863_v60, %v862_v9  ;;  %v864_v34 = vsel %vm800_vm12, %v1485_v2, 0.0  ;;  %v940_v15 = vsel %vm259_vm0, %v853_v46, 0.0  ;;  %936 = vadd.xlane.f32.xlu1 %v935_v41  ;;  %v865_v37 = vsel %vm801_vm8, %v1486_v0, 0.0 }
 0x115   : > { %v941_v58 = vadd.f32 %v940_v15, %v939_v22  ;;  %v860_v56 = vsel %vm796_vm1, %v1487_v29, 0.0  ;;  %v861_v54 = vsel %vm797_vm9, %v1488_v25, 0.0  ;;  %v947_v39 = vadd.f32 %v946_v61, %v945_v48  ;;  %v979_v38 = vpop.xlane.xlu0 %978  ;;  %v2819_v22 = vld [vmem:[#allocation4_spill] sm:$0xff]  ;;  %v2820_v48 = vld [vmem:[#allocation3_spill] sm:$0xff] }
 0x116   : > { %v951_v5 = vadd.f32 %v950_v43, %v860_v56  ;;  %v957_v53 = vadd.f32 %v956_v27, %v864_v34  ;;  %v958_v40 = vsel %vm259_vm0, %v865_v37, 0.0  ;;  %v952_v47 = vsel %vm259_vm0, %v861_v54, 0.0  ;;  %v2821_v54 = vld [vmem:[#allocation2_spill] sm:$0xff] }
 0x117   : > { %942 = vadd.xlane.f32.xlu0 %v941_v58  ;;  %v1075_v34 = vmul.f32 0.0025575447, %v973_v57  ;;  %v1076_v29 = vmul.f32 0.0025575447, %v979_v38  ;;  %vm1154_vm0 = vcmask 7168  }
 0x118   : > { %948 = vadd.xlane.f32.xlu1 %v947_v39  ;;  %v953_v7 = vadd.f32 %v952_v47, %v951_v5  ;;  %v959_v30 = vadd.f32 %v958_v40, %v957_v53  ;;  %v2822_v47 = vld [vmem:[#allocation5_spill] sm:$0xff] }
 0x119   : > { %v991_v46 = vpop.xlane.xlu0 %990 }
 0x11a   : > { %v967_v4 = vpop.xlane.xlu1 %966  ;;  %v2619_v56 = vmul.f32 0.0025575447, %v991_v46 }
 0x11b   : > { %954 = vadd.xlane.f32.xlu0 %v953_v7  ;;  %v1074_v43 = vmul.f32 0.0025575447, %v967_v4 }
 0x11c   : > { %960 = vadd.xlane.f32.xlu1 %v959_v30 }
 0x11d   : > { %v1003_v45 = vpop.xlane.xlu0 %1002 }
 0x11e   : > { %v2595_v51 = vpop.xlane.xlu1 %984  ;;  %v2621_v25 = vmul.f32 0.0025575447, %v1003_v45 }
 0x11f   : > { %v1077_v38 = vmul.f32 0.0025575447, %v2595_v51 }
 0x121   : > { %v2597_v11 = vpop.xlane.xlu0 %1014 }
 0x122   : > { %v2599_v10 = vpop.xlane.xlu1 %996  ;;  %v2626_v30 = vmul.f32 0.0025575447, %v2597_v11  ;;  %v2823_v11 = vld [vmem:[#allocation9_spill] sm:$0xff] }
 0x125   : > { %v2601_v12 = vpop.xlane.xlu0 %1026 }
 0x126   : > { %v2603_v33 = vpop.xlane.xlu1 %1008 }
 0x129   : > { %v2605_v17 = vpop.xlane.xlu0 %1038 }
 0x12a   : > { %v2607_v19 = vpop.xlane.xlu1 %1020 }
 0x12e   : > { %v2609_v3 = vpop.xlane.xlu1 %1032 }
 0x153   : > { %v551_v18 = vpop.xlane.xlu0 %550 }
 0x154   : > { %1393 = vlog2.f32 %v551_v18 }
 0x159   : > { %v563_v28 = vpop.xlane.xlu0 %562 }
 0x15a   : > { %v557_v59 = vpop.xlane.xlu1 %556 }
 0x15b   : > { %1395 = vlog2.f32 %v557_v59 }
 0x15c   : > { %1397 = vlog2.f32 %v563_v28 }
 0x15d   : > { %v575_v63 = vpop.xlane.xlu0 %574 }
 0x15e   : > { %v569_v26 = vpop.xlane.xlu1 %568 }
 0x15f   : > { %1399 = vlog2.f32 %v569_v26 }
 0x160   : > { %1401 = vlog2.f32 %v575_v63 }
 0x161   : > { %v587_v16 = vpop.xlane.xlu0 %586  ;;  %v1394_v13 = vpop.eup %1393 }
 0x162   : > { %v581_v23 = vpop.xlane.xlu1 %580  ;;  %1403 = vlog2.f32 %v587_v16  ;;  %v643_v14 = vmul.f32 0.6931472, %v1394_v13  ;;  %v2639_v13 = vmul.f32 0.0025575447, %v2601_v12 }
 0x163   : > { %1405 = vlog2.f32 %v581_v23 }
 0x164   : > { %v674_v6 = vadd.f32 %v643_v14, %v2819_v22 }
 0x166   : > { %v593_v32 = vpop.xlane.xlu1 %592  ;;  %v1090_v0 = vsub.f32 %v674_v6, %v1074_v43 }
 0x167   : > { %1407 = vlog2.f32 %v593_v32 }
 0x168   : > { %v599_v52 = vpop.xlane.xlu0 %598  ;;  %v1396_v55 = vpop.eup %1395  ;;  %v1122_v45 = vmul.f32 0.1, %v1090_v0 }
 0x169   : > { %1409 = vlog2.f32 %v599_v52  ;;  %v1398_v49 = vpop.eup %1397  ;;  %v645_v36 = vmul.f32 0.6931472, %v1396_v55 }
 0x16a   : > { %v605_v44 = vpop.xlane.xlu1 %604  ;;  %v647_v60 = vmul.f32 0.6931472, %v1398_v49  ;;  %v2825_v49 = vld [vmem:[#allocation6_spill] sm:$0xff] }
 0x16b   : > { %1411 = vlog2.f32 %v605_v44  ;;  %v675_v27 = vadd.f32 %v645_v36, %v2820_v48  ;;  %v1081_v48 = vmul.f32 0.0025575447, %v2603_v33 }
 0x16c   : > { %v1400_v31 = vpop.eup %1399  ;;  %v676_v5 = vadd.f32 %v647_v60, %v2821_v54 }
 0x16d   : > { %v649_v41 = vmul.f32 0.6931472, %v1400_v31  ;;  %v1402_v61 = vpop.eup %1401  ;;  %v1091_v40 = vsub.f32 %v675_v27, %v1075_v34 }
 0x16e   : > { %v617_v20 = vpop.xlane.xlu1 %616  ;;  %v651_v53 = vmul.f32 0.6931472, %v1402_v61  ;;  %v1092_v23 = vsub.f32 %v676_v5, %v1076_v29 }
 0x16f   : > { %v1404_v2 = vpop.eup %1403  ;;  %v677_v7 = vadd.f32 %v649_v41, %v2822_v47  ;;  %v1123_v32 = vmul.f32 0.1, %v1091_v40  ;;  %v1079_v41 = vmul.f32 0.0025575447, %v2599_v10  ;;  %v1083_v47 = vmul.f32 0.0025575447, %v2607_v19 }
 0x170   : > { %v611_v24 = vpop.xlane.xlu0 %610  ;;  %v1406_v58 = vpop.eup %1405  ;;  %v655_v57 = vmul.f32 0.6931472, %v1404_v2  ;;  %v678_v44 = vadd.f32 %v651_v53, %v2823_v11  ;;  %v1124_v12 = vmul.f32 0.1, %v1092_v23  ;;  %v2828_v53 = vld [vmem:[#allocation7_spill] sm:$0xff] }
 0x171   : > { %1413 = vlog2.f32 %v611_v24  ;;  %v653_v46 = vmul.f32 0.6931472, %v1406_v58  ;;  %v1093_v52 = vsub.f32 %v677_v7, %v1077_v38 }
 0x172   : > { %1415 = vlog2.f32 %v617_v20  ;;  %v1094_v34 = vsub.f32 %v678_v44, %v2619_v56 }
 0x173   : > { %v679_v36 = vadd.f32 %v653_v46, %v2825_v49  ;;  %v1125_v0 = vmul.f32 0.1, %v1093_v52 }
 0x174   : > { %v629_v42 = vpop.xlane.xlu1 %628  ;;  %v1408_v39 = vpop.eup %1407 }
 0x175   : > { %1417 = vlog2.f32 %v629_v42  ;;  %v657_v26 = vmul.f32 0.6931472, %v1408_v39  ;;  %v2824_v42 = vld [vmem:[#allocation10_spill] sm:$0xff] }
 0x176   : > { %v1410_v4 = vpop.eup %1409  ;;  %v680_v51 = vadd.f32 %v655_v57, %v2824_v42  ;;  %v2827_v39 = vld [vmem:[#allocation26_spill] sm:$0xff] }
 0x178   : > { %v623_v50 = vpop.xlane.xlu0 %622  ;;  %v1412_v59 = vpop.eup %1411  ;;  %v1096_v58 = vsub.f32 %v680_v51, %v2621_v25 }
 0x179   : > { %1419 = vlog2.f32 %v623_v50  ;;  %v659_v50 = vmul.f32 0.6931472, %v1410_v4  ;;  %v661_v55 = vmul.f32 0.6931472, %v1412_v59 }
 0x17a   : > { %v1128_v59 = vmul.f32 0.1, %v1096_v58 }
 0x17b   : > { %v682_v33 = vadd.f32 %v659_v50, %v2827_v39  ;;  %v683_v40 = vadd.f32 %v661_v55, %v2828_v53  ;;  %v2829_v55 = vld [vmem:[#allocation12_spill] sm:$0xff]  ;;  %v1086_v39 = vmul.f32 0.0025575447, %v2605_v17 }
 0x17c   : > { %v641_v21 = vpop.xlane.xlu1 %640 }
 0x17d   : > { %1421 = vlog2.f32 %v641_v21  ;;  %v1099_v11 = vsub.f32 %v683_v40, %v1083_v47 }
 0x17e   : > { %v1414_v43 = vpop.eup %1413 }
 0x17f   : > { %v1416_v61 = vpop.eup %1415  ;;  %v663_v38 = vmul.f32 0.6931472, %v1414_v43  ;;  %v1131_v43 = vmul.f32 0.1, %v1099_v11 }
 0x180   : > { %v635_v35 = vpop.xlane.xlu0 %634  ;;  %v2611_v9 = vpop.xlane.xlu1 %1044  ;;  %v665_v56 = vmul.f32 0.6931472, %v1416_v61 }
 0x181   : > { %1423 = vlog2.f32 %v635_v35 }
 0x182   : > { %v1418_v25 = vpop.eup %1417 }
 0x183   : > { %v669_v42 = vmul.f32 0.6931472, %v1418_v25 }
 0x184   : > { %v2615_v15 = vpop.xlane.xlu0 %1050  ;;  %v2617_v37 = vpop.xlane.xlu1 %1056 }
 0x185   : > { %v1088_v25 = vmul.f32 0.0025575447, %v2615_v15 }
 0x188   : > { %v871_v18 = vpop.xlane.xlu0 %870  ;;  %v877_v28 = vpop.xlane.xlu1 %876 }
 0x189   : > { %v1058_v63 = vsub.f32 %v674_v6, %v871_v18  ;;  %v1059_v16 = vsub.f32 %v675_v27, %v877_v28  ;;  %v2826_v6 = vld [vmem:[#allocation8_spill] sm:$0xff]  ;;  %v1126_v18 = vmul.f32 0.1, %v1094_v34  ;;  %v2831_v34 = vld [vmem:[#allocation25_spill] sm:$0xff] }
 0x18a   : > { %v681_v60 = vadd.f32 %v657_v26, %v2826_v6  ;;  %v1420_v26 = vpop.eup %1419  ;;  %v1085_v6 = vmul.f32 0.0025575447, %v2609_v3 }
 0x18b   : > { %v1106_v20 = vmul.f32 0.9, %v1058_v63  ;;  %v1107_v24 = vmul.f32 0.9, %v1059_v16  ;;  %v1098_v16 = vsub.f32 %v682_v33, %v2626_v30 }
 0x18c   : > { %v883_v14 = vpop.xlane.xlu0 %882  ;;  %v889_v21 = vpop.xlane.xlu1 %888  ;;  %v1097_v4 = vsub.f32 %v681_v60, %v1081_v48 }
 0x18d   : > { %v1138_v31 = vadd.f32 %v1122_v45, %v1106_v20  ;;  %v1060_v35 = vsub.f32 %v676_v5, %v883_v14  ;;  %v1139_v22 = vadd.f32 %v1123_v32, %v1107_v24  ;;  %v1061_v27 = vsub.f32 %v677_v7, %v889_v21  ;;  %v2830_v21 = vld [vmem:[#allocation11_spill] sm:$0xff] }
 0x18e   : > { %v1095_v5 = vsub.f32 %v679_v36, %v1079_v41  ;;  %v1129_v20 = vmul.f32 0.1, %v1097_v4  ;;  %v684_v14 = vadd.f32 %v663_v38, %v2829_v55  ;;  %v685_v49 = vadd.f32 %v665_v56, %v2830_v21 }
 0x18f   : > { %1155 = vst.msk [vmem:[%s2636_s22] sm:$0xff] %vm1154_vm0, %v1138_v31  ;;  %v1108_v2 = vmul.f32 0.9, %v1060_v35  ;;  %1156 = vst.msk [vmem:[%s2636_s22 + $0x8] sm:$0xff] %vm1154_vm0, %v1139_v22  ;;  %v1109_v54 = vmul.f32 0.9, %v1061_v27 }
 0x190   : > { %v895_v29 = vpop.xlane.xlu0 %894  ;;  %v901_v10 = vpop.xlane.xlu1 %900  ;;  %v1127_v23 = vmul.f32 0.1, %v1095_v5  ;;  %v667_v31 = vmul.f32 0.6931472, %v1420_v26  ;;  %v1100_v58 = vsub.f32 %v684_v14, %v2639_v13 }
 0x191   : > { %v1140_v7 = vadd.f32 %v1124_v12, %v1108_v2  ;;  %v1062_v57 = vsub.f32 %v678_v44, %v895_v29  ;;  %v1141_v46 = vadd.f32 %v1125_v0, %v1109_v54  ;;  %v1063_v45 = vsub.f32 %v679_v36, %v901_v10  ;;  %v1422_v36 = vpop.eup %1421 }
 0x192   : > { %v1424_v30 = vpop.eup %1423  ;;  %v673_v2 = vmul.f32 0.6931472, %v1422_v36  ;;  %v687_v0 = vadd.f32 %v669_v42, %v2831_v34  ;;  %v1101_v29 = vsub.f32 %v685_v49, %v1085_v6  ;;  %v686_v10 = vadd.f32 %v667_v31, %v2080_v1 }
 0x193   : > { %1157 = vst.msk [vmem:[%s2636_s22 + $0x10] sm:$0xff] %vm1154_vm0, %v1140_v7  ;;  %v1110_v28 = vmul.f32 0.9, %v1062_v57  ;;  %1158 = vst.msk [vmem:[%s2636_s22 + $0x18] sm:$0xff] %vm1154_vm0, %v1141_v46  ;;  %v1111_v19 = vmul.f32 0.9, %v1063_v45 }
 0x194   : > { %v907_v63 = vpop.xlane.xlu0 %906  ;;  %v913_v32 = vpop.xlane.xlu1 %912  ;;  %v671_v54 = vmul.f32 0.6931472, %v1424_v30  ;;  %v689_v38 = vadd.f32 %v673_v2, %v2020_v62  ;;  %v1132_v56 = vmul.f32 0.1, %v1100_v58  ;;  %v1133_v46 = vmul.f32 0.1, %v1101_v29 }
 0x195   : > { %v1142_v44 = vadd.f32 %v1126_v18, %v1110_v28  ;;  %v1064_v52 = vsub.f32 %v680_v51, %v907_v63  ;;  %v1065_v24 = vsub.f32 %v681_v60, %v913_v32  ;;  %v1143_v50 = vadd.f32 %v1127_v23, %v1111_v19 }
 0x196   : > { %v1130_v51 = vmul.f32 0.1, %v1098_v16  ;;  %v688_v45 = vadd.f32 %v671_v54, %v2136_v8  ;;  %v1102_v17 = vsub.f32 %v686_v10, %v1086_v39  ;;  %v1089_v18 = vmul.f32 0.0025575447, %v2617_v37 }
 0x197   : > { %1159 = vst.msk [vmem:[%s2636_s22 + $0x20] sm:$0xff] %vm1154_vm0, %v1142_v44  ;;  %v1112_v35 = vmul.f32 0.9, %v1064_v52  ;;  %v1113_v22 = vmul.f32 0.9, %v1065_v24  ;;  %1160 = vst.msk [vmem:[%s2636_s22 + $0x28] sm:$0xff] %vm1154_vm0, %v1143_v50 }
 0x198   : > { %v919_v60 = vpop.xlane.xlu0 %918  ;;  %v1105_v19 = vsub.f32 %v689_v38, %v1089_v18  ;;  %v1104_v16 = vsub.f32 %v688_v45, %v1088_v25  ;;  %v1134_v32 = vmul.f32 0.1, %v1102_v17 }
 0x199   : > { %v925_v41 = vpop.xlane.xlu1 %924  ;;  %v1144_v48 = vadd.f32 %v1128_v59, %v1112_v35  ;;  %v1066_v12 = vsub.f32 %v682_v33, %v919_v60  ;;  %v1145_v27 = vadd.f32 %v1129_v20, %v1113_v22  ;;  %v1087_v33 = vmul.f32 0.0025575447, %v2611_v9 }
 0x19a   : > { %v1067_v61 = vsub.f32 %v683_v40, %v925_v41  ;;  %v1137_v50 = vmul.f32 0.1, %v1105_v19  ;;  %v1136_v55 = vmul.f32 0.1, %v1104_v16 }
 0x19b   : > { %1161 = vst.msk [vmem:[%s2636_s22 + $0x30] sm:$0xff] %vm1154_vm0, %v1144_v48  ;;  %v1114_v3 = vmul.f32 0.9, %v1066_v12  ;;  %1162 = vst.msk [vmem:[%s2636_s22 + $0x38] sm:$0xff] %vm1154_vm0, %v1145_v27  ;;  %v1103_v4 = vsub.f32 %v687_v0, %v1087_v33 }
 0x19c   : > { %v1115_v5 = vmul.f32 0.9, %v1067_v61  ;;  %v931_v53 = vpop.xlane.xlu0 %930 }
 0x19d   : > { %v937_v40 = vpop.xlane.xlu1 %936  ;;  %v1146_v47 = vadd.f32 %v1130_v51, %v1114_v3  ;;  %v1068_v13 = vsub.f32 %v684_v14, %v931_v53  ;;  %v1135_v8 = vmul.f32 0.1, %v1103_v4 }
 0x19e   : > { %v1147_v7 = vadd.f32 %v1131_v43, %v1115_v5  ;;  %v1069_v57 = vsub.f32 %v685_v49, %v937_v40 }
 0x19f   : > { %1163 = vst.msk [vmem:[%s2636_s22 + $0x40] sm:$0xff] %vm1154_vm0, %v1146_v47  ;;  %v1116_v1 = vmul.f32 0.9, %v1068_v13 }
 0x1a0   : > { %1164 = vst.msk [vmem:[%s2636_s22 + $0x48] sm:$0xff] %vm1154_vm0, %v1147_v7  ;;  %v1117_v9 = vmul.f32 0.9, %v1069_v57  ;;  %v943_v28 = vpop.xlane.xlu0 %942 }
 0x1a1   : > { %v949_v59 = vpop.xlane.xlu1 %948  ;;  %v1148_v62 = vadd.f32 %v1132_v56, %v1116_v1  ;;  %v1070_v26 = vsub.f32 %v686_v10, %v943_v28 }
 0x1a2   : > { %v1149_v63 = vadd.f32 %v1133_v46, %v1117_v9  ;;  %v1071_v23 = vsub.f32 %v687_v0, %v949_v59 }
 0x1a3   : > { %1165 = vst.msk [vmem:[%s2636_s22 + $0x50] sm:$0xff] %vm1154_vm0, %v1148_v62  ;;  %v1118_v11 = vmul.f32 0.9, %v1070_v26 }
 0x1a4   : > { %1166 = vst.msk [vmem:[%s2636_s22 + $0x58] sm:$0xff] %vm1154_vm0, %v1149_v63  ;;  %v1119_v15 = vmul.f32 0.9, %v1071_v23  ;;  %v955_v37 = vpop.xlane.xlu0 %954 }
 0x1a5   : > { %v961_v44 = vpop.xlane.xlu1 %960  ;;  %v1150_v52 = vadd.f32 %v1134_v32, %v1118_v11  ;;  %v1072_v20 = vsub.f32 %v688_v45, %v955_v37 }
 0x1a6   : > { %v1151_v24 = vadd.f32 %v1135_v8, %v1119_v15  ;;  %v1073_v42 = vsub.f32 %v689_v38, %v961_v44 }
 0x1a7   : > { %1167 = vst.msk [vmem:[%s2636_s22 + $0x60] sm:$0xff] %vm1154_vm0, %v1150_v52  ;;  %v1120_v14 = vmul.f32 0.9, %v1072_v20 }
 0x1a8   : > { %1168 = vst.msk [vmem:[%s2636_s22 + $0x68] sm:$0xff] %vm1154_vm0, %v1151_v24  ;;  %v1121_v21 = vmul.f32 0.9, %v1073_v42 }
 0x1a9   : > { %v1152_v49 = vadd.f32 %v1136_v55, %v1120_v14 }
 0x1aa   : > { %v1153_v36 = vadd.f32 %v1137_v50, %v1121_v21 }
 0x1ab   : > { %1169 = vst.msk [vmem:[%s2636_s22 + $0x70] sm:$0xff] %vm1154_vm0, %v1152_v49 }
 0x1ac   : > { %1170 = vst.msk [vmem:[%s2636_s22 + $0x78] sm:$0xff] %vm1154_vm0, %v1153_v36 }
 0x1ad PF: > { %s12_s9 = sadd.s32 1, %s1495_s9  }
 0x1ae   : > { %p9_p4 = scmp.ge.s32.totalorder %s12_s9, 4  }
 0x1b0   :  { %11 = sbr.rel (!%p9_p4) target bundleno = 1 (0x1), region = 61 }

</bundles_post_ra>
